<compile_context>
chip_gen: v5e
topology: v5e:2x2
jax: 0.10.0
libtpu: 0.0.40
codegen_flags: <defaults>
</compile_context>

<pallas_src>
import functools

import jax
import jax.numpy as jnp
from jax.experimental import pallas as pl
from jax.experimental.pallas import tpu as pltpu

_EPS = 1e-5
_NEG_SLOPE = 0.3


def _round_up(v, m):
    return (v + m - 1) // m * m


def _leaky_relu(x):
    return jnp.where(x > 0, x, _NEG_SLOPE * x)


# --------------------------------------------------------------------------
# Stage 1:  h1 = Conv1(LeakyReLU(BN1(x)))   (halo'd per-tile output, bf16)
#           + BN2 partial statistics (f32, owned rows only)
# --------------------------------------------------------------------------
def _stage1_kernel(xp_hbm, a1_ref, c1_ref, w1_ref, b1_ref,
                   h1_ref, st_ref,
                   xbuf, sem,
                   *, l_tile, ksize, pad_left, seq_len):
    b = pl.program_id(0)
    l = pl.program_id(1)
    n_l = pl.num_programs(1)
    halo = l_tile + ksize - 1          # h1 rows this tile produces (incl. halo)
    halo2 = l_tile + 2 * (ksize - 1)   # x rows this tile consumes
    slot = l % 2

    def fetch(tile_idx, s):
        pltpu.make_async_copy(
            xp_hbm.at[b, pl.ds(tile_idx * l_tile, halo2), :],
            xbuf.at[s], sem.at[s]).start()

    # Prime per-batch pipeline (megacore-safe: every b primes its own l=0).
    @pl.when(l == 0)
    def _():
        fetch(0, 0)

    # Wait for the current halo'd tile, then prefetch the next one.
    pltpu.make_async_copy(
        xp_hbm.at[b, pl.ds(l * l_tile, halo2), :],
        xbuf.at[slot], sem.at[slot]).wait()

    @pl.when(l + 1 < n_l)
    def _():
        fetch(l + 1, 1 - slot)

    xt = xbuf[slot]                                            # (halo2, Cip) f32
    act = _leaky_relu(xt * a1_ref[...] + c1_ref[...])          # folded BN1 (f32)
    # Rows whose global x index lies outside [0, L) are the conv's 'same'
    # zero padding (they must be zero *after* BN+LeakyReLU).
    gx = (l * l_tile - 2 * pad_left
          + jax.lax.broadcasted_iota(jnp.int32, (halo2, 1), 0))
    act = jnp.where((gx >= 0) & (gx < seq_len), act, 0.0)
    act = act.astype(jnp.bfloat16)                             # bf16 MXU operand

    # im2col: one MXU matmul with contraction depth K*Cip, bf16 operands,
    # f32 accumulation.
    patch = jnp.concatenate([act[k:k + halo, :] for k in range(ksize)],
                            axis=1)                            # (halo, K*Cip) bf16
    h = jnp.dot(patch, w1_ref[...],
                preferred_element_type=jnp.float32) + b1_ref[...]   # f32

    # Store halo'd h1 tile in bf16 (halves the HBM round trip).
    h1_ref[0, 0] = h.astype(jnp.bfloat16)

    # BN2 partial statistics from the f32 result, counting only rows this tile
    # "owns" (central l_tile rows) and that lie inside [0, L).
    ih = jax.lax.broadcasted_iota(jnp.int32, (halo, 1), 0)
    own = (ih >= pad_left) & (ih < pad_left + l_tile)
    gh = l * l_tile - pad_left + ih
    vm = (own & (gh < seq_len)).astype(jnp.float32)
    hv = h * vm
    psum = jnp.sum(hv, axis=0, keepdims=True)                  # (1, Cop)
    psq = jnp.sum(hv * hv, axis=0, keepdims=True)              # (1, Cop)

    @pl.when(l == 0)
    def _():
        st_ref[...] = jnp.zeros_like(st_ref)
    st_ref[...] += jnp.concatenate([psum, psq], axis=0)[None]  # (1, 2, Cop)


# --------------------------------------------------------------------------
# Stage 2:  y = rescaler(x) + Conv2(LeakyReLU(BN2(h1))) ; MaxPool ; FMS sums
#           h1 halo blocks arrive via auto-pipelined BlockSpec (bf16);
#           the residual x tile arrives via a manual double-buffered DMA
#           from the single shared x_halo buffer (offset 2*left).
# --------------------------------------------------------------------------
def _stage2_kernel(x_hbm, h1_ref, a2_ref, c2_ref, w2_ref, b2_ref, *rest,
                   l_tile, ksize, pad_left, seq_len, pool, l_out,
                   has_rescaler):
    if has_rescaler:
        wr_ref, br_ref, yp_ref, fs_ref, xbuf, sem, ybuf = rest
    else:
        yp_ref, fs_ref, xbuf, sem, ybuf = rest
        wr_ref = br_ref = None

    b = pl.program_id(0)
    l = pl.program_id(1)
    n_l = pl.num_programs(1)
    halo = l_tile + ksize - 1
    tp = l_tile // pool
    slot = l % 2

    def fetch(tile_idx, s):
        pltpu.make_async_copy(
            x_hbm.at[b, pl.ds(2 * pad_left + tile_idx * l_tile, l_tile), :],
            xbuf.at[s], sem.at[s]).start()

    @pl.when(l == 0)
    def _():
        fetch(0, 0)

    pltpu.make_async_copy(
        x_hbm.at[b, pl.ds(2 * pad_left + l * l_tile, l_tile), :],
        xbuf.at[slot], sem.at[slot]).wait()

    @pl.when(l + 1 < n_l)
    def _():
        fetch(l + 1, 1 - slot)

    # BN2 + LeakyReLU on the halo'd bf16 h1 tile (apply in f32).
    ht = h1_ref[0, 0].astype(jnp.float32)                      # (halo, Cop)
    act = _leaky_relu(ht * a2_ref[...] + c2_ref[...])
    gh = (l * l_tile - pad_left
          + jax.lax.broadcasted_iota(jnp.int32, (halo, 1), 0))
    act = jnp.where((gh >= 0) & (gh < seq_len), act, 0.0)
    act = act.astype(jnp.bfloat16)                             # bf16 MXU operand

    patch = jnp.concatenate([act[k:k + l_tile, :] for k in range(ksize)],
                            axis=1)                            # (TL, K*Cop) bf16
    h2 = jnp.dot(patch, w2_ref[...],
                 preferred_element_type=jnp.float32) + b2_ref[...]

    # Residual path: 1x1 conv (bf16 operands) or identity (statically skipped).
    res = xbuf[slot]                                           # (TL, Cip) f32
    if has_rescaler:
        res = jnp.dot(res.astype(jnp.bfloat16), wr_ref[...],
                      preferred_element_type=jnp.float32) + br_ref[...]
    y = res + h2                                               # (TL, Cop) f32

    # MaxPool1d(pool): m strided VMEM reads + VPU maxima (no reshape/reduce).
    if pool == 1:
        yp = y
    else:
        ybuf[...] = y
        yp = ybuf[pl.ds(0, tp, stride=pool), :]
        for j in range(1, pool):
            yp = jnp.maximum(yp, ybuf[pl.ds(j, tp, stride=pool), :])

    yp_ref[0] = yp

    # FMS partial sums over the valid pooled rows only (f32).
    gp = l * tp + jax.lax.broadcasted_iota(jnp.int32, (tp, 1), 0)
    vm = (gp < l_out).astype(jnp.float32)
    ps = jnp.sum(yp * vm, axis=0, keepdims=True)               # (1, Cop)

    @pl.when(l == 0)
    def _():
        fs_ref[...] = jnp.zeros_like(fs_ref)
    fs_ref[...] += ps[None]                                    # (1, 1, Cop)


# --------------------------------------------------------------------------
# Wrapper
# --------------------------------------------------------------------------
def resblock_forward(x_ncl, params, *, kernel_size, maxpool_kernel_size,
                     l_tile=None):
    """x_ncl: (B, Cin, L) float32 (PyTorch layout). Returns (B, Co, L // m)."""
    f32 = jnp.float32
    bf16 = jnp.bfloat16
    x_ncl = x_ncl.astype(f32)
    B, Cin, L = x_ncl.shape
    K = int(kernel_size)
    m = int(maxpool_kernel_size)
    Co = params["w1"].shape[0]
    Lout = L // m

    # Lane-dense channel padding (multiple of 128).
    Cip = _round_up(max(Cin, 128), 128)
    Cop = _round_up(max(Co, 128), 128)

    left = (K - 1) // 2
    right = (K - 1) - left

    # L tile: multiple of 8*m so pooled blocks keep (8,128) alignment and pool
    # windows never cross tile boundaries.  Big tiles amortize per-step cost.
    base = 8 * m
    if l_tile is None:
        l_tile = _round_up(min(L, 1024), base)
    else:
        l_tile = _round_up(int(l_tile), base)
    n_l = -(-L // l_tile)
    Lt = n_l * l_tile
    tp = l_tile // m
    halo = l_tile + K - 1            # h1 rows per stage-1 tile / stage-2 read
    halo2 = l_tile + 2 * (K - 1)     # x rows per stage-1 tile

    # ---- hoisted BN1 statistics (training mode, biased var, two-pass) -------
    g1 = params["bn1_g"].astype(f32)
    be1 = params["bn1_b"].astype(f32)
    mean1 = jnp.mean(x_ncl, axis=(0, 2))
    var1 = jnp.mean(jnp.square(x_ncl - mean1[None, :, None]), axis=(0, 2))
    a1 = g1 * jax.lax.rsqrt(var1 + _EPS)
    c1 = be1 - mean1 * a1
    a1p = jnp.pad(a1, (0, Cip - Cin)).reshape(1, Cip)
    c1p = jnp.pad(c1, (0, Cip - Cin)).reshape(1, Cip)

    # ---- single padded copy of x: NCL -> NLC, channel pad, L halo pad -------
    LH1 = Lt + 2 * (K - 1)
    x_nlc = jnp.transpose(x_ncl, (0, 2, 1))                    # (B, L, Cin)
    x_halo = jnp.pad(x_nlc, ((0, 0),
                             (2 * left, LH1 - 2 * left - L),
                             (0, Cip - Cin)))                  # (B, LH1, Cip)

    # ---- weights in im2col / channels-last layout, bf16 MXU operands --------
    w1 = jnp.transpose(params["w1"].astype(f32), (2, 1, 0))    # (K, Cin, Co)
    w1 = jnp.pad(w1, ((0, 0), (0, Cip - Cin), (0, Cop - Co)))
    w1 = w1.reshape(K * Cip, Cop).astype(bf16)
    b1 = jnp.pad(params["b1"].astype(f32), (0, Cop - Co)).reshape(1, Cop)
    w2 = jnp.transpose(params["w2"].astype(f32), (2, 1, 0))    # (K, Co, Co)
    w2 = jnp.pad(w2, ((0, 0), (0, Cop - Co), (0, Cop - Co)))
    w2 = w2.reshape(K * Cop, Cop).astype(bf16)
    b2 = jnp.pad(params["b2"].astype(f32), (0, Cop - Co)).reshape(1, Cop)

    has_rescaler = params.get("wr") is not None
    if has_rescaler:
        wr = params["wr"].astype(f32)[:, :, 0].T               # (Cin, Co)
        wr = jnp.pad(wr, ((0, Cip - Cin), (0, Cop - Co))).astype(bf16)
        br = jnp.pad(params["br"].astype(f32), (0, Cop - Co)).reshape(1, Cop)

    lin_w = jnp.pad(params["lin_w"].astype(f32).T,
                    ((0, Cop - Co), (0, Cop - Co)))
    lin_b = jnp.pad(params["lin_b"].astype(f32), (0, Cop - Co)).reshape(1, Cop)

    cparams = pltpu.CompilerParams(
        dimension_semantics=("parallel", "arbitrary"),
        vmem_limit_bytes=48 * 1024 * 1024)

    # ---------------- stage 1: BN1 -> LeakyReLU -> Conv1 ---------------------
    k1 = functools.partial(_stage1_kernel, l_tile=l_tile, ksize=K,
                           pad_left=left, seq_len=L)
    h1, st = pl.pallas_call(
        k1,
        out_shape=(jax.ShapeDtypeStruct((B, n_l, halo, Cop), bf16),
                   jax.ShapeDtypeStruct((B, 2, Cop), f32)),
        grid_spec=pltpu.PrefetchScalarGridSpec(
            num_scalar_prefetch=0,
            grid=(B, n_l),
            in_specs=[
                pl.BlockSpec(memory_space=pl.ANY),                    # x halo (HBM)
                pl.BlockSpec((1, Cip), lambda b, l: (0, 0)),          # a1
                pl.BlockSpec((1, Cip), lambda b, l: (0, 0)),          # c1
                pl.BlockSpec((K * Cip, Cop), lambda b, l: (0, 0)),    # w1 (bf16)
                pl.BlockSpec((1, Cop), lambda b, l: (0, 0)),          # b1
            ],
            out_specs=(
                pl.BlockSpec((1, 1, halo, Cop), lambda b, l: (b, l, 0, 0)),
                pl.BlockSpec((1, 2, Cop), lambda b, l: (b, 0, 0)),    # BN2 sums
            ),
            scratch_shapes=[
                pltpu.VMEM((2, halo2, Cip), f32),
                pltpu.SemaphoreType.DMA((2,)),
            ]),
        compiler_params=cparams,
        cost_estimate=pl.CostEstimate(
            flops=2 * B * n_l * halo * K * Cip * Cop,
            transcendentals=0,
            bytes_accessed=4 * B * Lt * Cip + 2 * B * n_l * halo * Cop),
    )(x_halo, a1p, c1p, w1, b1)

    # ---- finish BN2 statistics (tiny; single-pass E[x^2]-E[x]^2 w/ clamp) ---
    n_stat = float(B * L)
    sum2 = jnp.sum(st[:, 0, :], axis=0)
    sq2 = jnp.sum(st[:, 1, :], axis=0)
    mean2 = sum2 / n_stat
    var2 = jnp.maximum(sq2 / n_stat - jnp.square(mean2), 0.0)
    g2 = jnp.pad(params["bn2_g"].astype(f32), (0, Cop - Co))
    be2 = jnp.pad(params["bn2_b"].astype(f32), (0, Cop - Co))
    a2 = (g2 * jax.lax.rsqrt(var2 + _EPS)).reshape(1, Cop)
    c2 = (be2 - mean2 * a2[0]).reshape(1, Cop)

    # -------- stage 2: BN2 -> LeakyReLU -> Conv2 ; +rescaler ; MaxPool -------
    k2 = functools.partial(_stage2_kernel, l_tile=l_tile, ksize=K,
                           pad_left=left, seq_len=L, pool=m, l_out=Lout,
                           has_rescaler=has_rescaler)
    in_specs = [
        pl.BlockSpec(memory_space=pl.ANY),                            # x halo (HBM)
        pl.BlockSpec((1, 1, halo, Cop), lambda b, l: (b, l, 0, 0)),   # h1 halo blk
        pl.BlockSpec((1, Cop), lambda b, l: (0, 0)),                  # a2
        pl.BlockSpec((1, Cop), lambda b, l: (0, 0)),                  # c2
        pl.BlockSpec((K * Cop, Cop), lambda b, l: (0, 0)),            # w2 (bf16)
        pl.BlockSpec((1, Cop), lambda b, l: (0, 0)),                  # b2
    ]
    args = [x_halo, h1, a2, c2, w2, b2]
    if has_rescaler:
        in_specs += [pl.BlockSpec((Cip, Cop), lambda b, l: (0, 0)),   # wr (bf16)
                     pl.BlockSpec((1, Cop), lambda b, l: (0, 0))]     # br
        args += [wr, br]

    y_pool, fsum = pl.pallas_call(
        k2,
        out_shape=(jax.ShapeDtypeStruct((B, n_l * tp, Cop), f32),
                   jax.ShapeDtypeStruct((B, 1, Cop), f32)),
        grid_spec=pltpu.PrefetchScalarGridSpec(
            num_scalar_prefetch=0,
            grid=(B, n_l),
            in_specs=in_specs,
            out_specs=(
                pl.BlockSpec((1, tp, Cop), lambda b, l: (b, l, 0)),
                pl.BlockSpec((1, 1, Cop), lambda b, l: (b, 0, 0)),    # FMS sums
            ),
            scratch_shapes=[
                pltpu.VMEM((2, l_tile, Cip), f32),                    # residual x
                pltpu.SemaphoreType.DMA((2,)),
                pltpu.VMEM((l_tile, Cop), f32),                       # maxpool buf
            ]),
        compiler_params=cparams,
        cost_estimate=pl.CostEstimate(
            flops=2 * B * Lt * Cop * (K * Cop + (Cip if has_rescaler else 0)),
            transcendentals=0,
            bytes_accessed=(2 * B * n_l * halo * Cop + 4 * B * Lt * Cip
                            + 4 * B * (Lt // m) * Cop)),
    )(*args)

    # ---- FMS scale (tiny): mean over valid pooled length -> Linear -> sigmoid
    mean_pool = fsum[:, 0, :] / float(Lout)                    # (B, Cop)
    s = jax.nn.sigmoid(mean_pool @ lin_w + lin_b)              # (B, Cop)
    s3 = s[:, None, :]

    # FMS apply as plain XLA (fuses with the final slice + transpose).
    out_nlc = s3 + s3 * y_pool                                 # (B, n_l*tp, Cop)

    # Glue: drop channel/length padding, back to PyTorch NCL layout.
    return jnp.transpose(out_nlc[:, :Lout, :Co], (0, 2, 1))


# --------------------------------------------------------------------------
# Pure-JAX reference (mirrors the PyTorch module semantics) for self-check.
# --------------------------------------------------------------------------
def _reference_forward(x_ncl, params, kernel_size, maxpool_kernel_size):
    f32 = jnp.float32
    x = jnp.transpose(x_ncl.astype(f32), (0, 2, 1))            # (B, L, Cin)

    def bn(h, g, b):
        mu = jnp.mean(h, axis=(0, 1), keepdims=True)
        va = jnp.mean(jnp.square(h - mu), axis=(0, 1), keepdims=True)
        return (h - mu) * jax.lax.rsqrt(va + _EPS) * g + b

    def conv_same(h, w_t, b_t, K):
        Bn, Ln, Ci = h.shape
        Con = w_t.shape[0]
        w = jnp.transpose(w_t.astype(f32), (2, 1, 0))          # (K, Cin, Co)
        lpad = (K - 1) // 2
        rpad = (K - 1) - lpad
        hp = jnp.pad(h, ((0, 0), (lpad, rpad), (0, 0)))
        out = jnp.zeros((Bn, Ln, Con), f32)
        for k in range(K):
            out = out + jnp.einsum("blc,cd->bld", hp[:, k:k + Ln, :], w[k])
        return out + b_t.astype(f32).reshape(1, 1, Con)

    h = _leaky_relu(bn(x, params["bn1_g"].astype(f32), params["bn1_b"].astype(f32)))
    h = conv_same(h, params["w1"], params["b1"], kernel_size)
    h = _leaky_relu(bn(h, params["bn2_g"].astype(f32), params["bn2_b"].astype(f32)))
    h = conv_same(h, params["w2"], params["b2"], kernel_size)

    if params.get("wr") is not None:
        res = jnp.einsum("blc,oc->blo", x, params["wr"].astype(f32)[:, :, 0])
        res = res + params["br"].astype(f32).reshape(1, 1, -1)
    else:
        res = x
    y = res + h

    Bn, Ln, Con = y.shape
    m = maxpool_kernel_size
    Lo = Ln // m
    y = y[:, :Lo * m, :].reshape(Bn, Lo, m, Con).max(axis=2)

    s = jax.nn.sigmoid(jnp.mean(y, axis=1) @ params["lin_w"].astype(f32).T
                       + params["lin_b"].astype(f32))
    out = s[:, None, :] + s[:, None, :] * y
    return jnp.transpose(out, (0, 2, 1))                       # (B, Co, Lo)


if __name__ == "__main__":
    B, Cin, Co, L = 2, 4, 8, 64
    K, MP = 3, 2

    key = jax.random.PRNGKey(0)
    ks = jax.random.split(key, 13)
    params = {
        "bn1_g": 1.0 + 0.1 * jax.random.normal(ks[0], (Cin,), jnp.float32),
        "bn1_b": 0.1 * jax.random.normal(ks[1], (Cin,), jnp.float32),
        "w1":    0.2 * jax.random.normal(ks[2], (Co, Cin, K), jnp.float32),
        "b1":    0.1 * jax.random.normal(ks[3], (Co,), jnp.float32),
        "bn2_g": 1.0 + 0.1 * jax.random.normal(ks[4], (Co,), jnp.float32),
        "bn2_b": 0.1 * jax.random.normal(ks[5], (Co,), jnp.float32),
        "w2":    0.2 * jax.random.normal(ks[6], (Co, Co, K), jnp.float32),
        "b2":    0.1 * jax.random.normal(ks[7], (Co,), jnp.float32),
        "wr":    0.2 * jax.random.normal(ks[8], (Co, Cin, 1), jnp.float32),
        "br":    0.1 * jax.random.normal(ks[9], (Co,), jnp.float32),
        "lin_w": 0.2 * jax.random.normal(ks[10], (Co, Co), jnp.float32),
        "lin_b": 0.1 * jax.random.normal(ks[11], (Co,), jnp.float32),
    }
    x = jax.random.normal(ks[12], (B, Cin, L), jnp.float32)

    # Small explicit l_tile to exercise the multi-tile pipelining paths.
    fwd = jax.jit(functools.partial(resblock_forward, kernel_size=K,
                                    maxpool_kernel_size=MP, l_tile=16))
    out = jax.block_until_ready(fwd(x, params))

    assert out.shape == (B, Co, L // MP), out.shape
    assert bool(jnp.all(jnp.isfinite(out)))

    ref = _reference_forward(x, params, K, MP)
    err = float(jnp.max(jnp.abs(out - ref)))
    # bf16 MXU operands / bf16 h1 intermediate => ~1e-2 worst-case abs error.
    assert err < 5e-2, f"max abs error vs reference: {err}"

    print("KERNEL_OK")
</pallas_src>

<mosaic_0001>
module attributes {stable_mosaic.version = 11 : i64} {
  func.func @_stage1_kernel(%arg0: i32, %arg1: i32, %arg2: memref<2x68x128xf32, #tpu.memory_space<any>>, %arg3: memref<1x128xf32, #tpu.memory_space<vmem>>, %arg4: memref<1x128xf32, #tpu.memory_space<vmem>>, %arg5: memref<384x128xbf16, #tpu.memory_space<vmem>>, %arg6: memref<1x128xf32, #tpu.memory_space<vmem>>, %arg7: memref<1x1x18x128xbf16, #tpu.memory_space<vmem>>, %arg8: memref<1x2x128xf32, #tpu.memory_space<vmem>>, %arg9: memref<2x20x128xf32, #tpu.memory_space<vmem>>, %arg10: memref<2x!tpu.dma_semaphore, #tpu.memory_space<semaphore_mem>>) attributes {dimension_semantics = [#tpu.dimension_semantics<parallel>, #tpu.dimension_semantics<arbitrary>], iteration_bounds = array<i64: 2, 4>, scalar_prefetch = 0 : i64, scratch_operands = 2 : i64, tpu.core_type = #tpu.core_type<tc>, window_params = [{}, {pipeline_mode = #tpu.pipeline_mode<synchronous>, transform_indices = @transform_1, window_bounds = array<i64: 1, 128>}, {pipeline_mode = #tpu.pipeline_mode<synchronous>, transform_indices = @transform_2, window_bounds = array<i64: 1, 128>}, {pipeline_mode = #tpu.pipeline_mode<synchronous>, transform_indices = @transform_3, window_bounds = array<i64: 384, 128>}, {pipeline_mode = #tpu.pipeline_mode<synchronous>, transform_indices = @transform_4, window_bounds = array<i64: 1, 128>}, {transform_indices = @transform_5, window_bounds = array<i64: 1, 1, 18, 128>}, {transform_indices = @transform_6, window_bounds = array<i64: 1, 2, 128>}]} {
    %c2_i32 = arith.constant 2 : i32
    %c0_i32 = arith.constant 0 : i32
    %0 = arith.cmpi eq, %c2_i32, %c0_i32 : i32
    %c1_i32 = arith.constant 1 : i32
    %1 = arith.select %0, %c1_i32, %c2_i32 : i32
    %2 = arith.remsi %arg1, %1 : i32
    %c0_i32_0 = arith.constant 0 : i32
    %3 = arith.cmpi ne, %2, %c0_i32_0 : i32
    %c0_i32_1 = arith.constant 0 : i32
    %4 = arith.cmpi slt, %2, %c0_i32_1 : i32
    %c0_i32_2 = arith.constant 0 : i32
    %5 = arith.cmpi slt, %1, %c0_i32_2 : i32
    %6 = arith.xori %4, %5 : i1
    %7 = arith.andi %6, %3 : i1
    %8 = arith.addi %2, %1 : i32
    %9 = arith.select %7, %8, %2 : i32
    %c0_i32_3 = arith.constant 0 : i32
    %10 = arith.cmpi eq, %arg1, %c0_i32_3 : i32
    %11 = arith.extui %10 : i1 to i32
    %c0_i32_4 = arith.constant 0 : i32
    %12 = arith.cmpi ne, %11, %c0_i32_4 : i32
    scf.if %12 {
      %c0_i32_43 = arith.constant 0 : i32
      %c0_i32_44 = arith.constant 0 : i32
      %c0_i32_45 = arith.constant 0 : i32
      %c0_i32_46 = arith.constant 0 : i32
      %96 = tpu.memref_slice %arg2[%arg0, %c0_i32_45, %c0_i32_46] : memref<2x68x128xf32, #tpu.memory_space<any>> -> memref<1x20x128xf32, #tpu.memory_space<any>>
      %97 = tpu.memref_squeeze %96 : memref<1x20x128xf32, #tpu.memory_space<any>> -> memref<20x128xf32, #tpu.memory_space<any>>
      %c0_i32_47 = arith.constant 0 : i32
      %c0_i32_48 = arith.constant 0 : i32
      %98 = tpu.memref_slice %arg9[%c0_i32_43, %c0_i32_47, %c0_i32_48] : memref<2x20x128xf32, #tpu.memory_space<vmem>> -> memref<1x20x128xf32, #tpu.memory_space<vmem>>
      %99 = tpu.memref_squeeze %98 : memref<1x20x128xf32, #tpu.memory_space<vmem>> -> memref<20x128xf32, #tpu.memory_space<vmem>>
      %100 = tpu.memref_slice %arg10[%c0_i32_44] : memref<2x!tpu.dma_semaphore, #tpu.memory_space<semaphore_mem>> -> memref<1x!tpu.dma_semaphore, #tpu.memory_space<semaphore_mem>>
      %101 = tpu.memref_squeeze %100 : memref<1x!tpu.dma_semaphore, #tpu.memory_space<semaphore_mem>> -> memref<!tpu.dma_semaphore, #tpu.memory_space<semaphore_mem>>
      tpu.enqueue_dma source(%97 : memref<20x128xf32, #tpu.memory_space<any>>) target(%99 : memref<20x128xf32, #tpu.memory_space<vmem>>) target_semaphore(%101 : memref<!tpu.dma_semaphore, #tpu.memory_space<semaphore_mem>>)
    } else {
    }
    %c16_i32 = arith.constant 16 : i32
    %13 = arith.muli %arg1, %c16_i32 : i32
    %c0_i32_5 = arith.constant 0 : i32
    %14 = tpu.memref_slice %arg2[%arg0, %13, %c0_i32_5] : memref<2x68x128xf32, #tpu.memory_space<any>> -> memref<1x20x128xf32, #tpu.memory_space<any>>
    %15 = tpu.memref_squeeze %14 : memref<1x20x128xf32, #tpu.memory_space<any>> -> memref<20x128xf32, #tpu.memory_space<any>>
    %c0_i32_6 = arith.constant 0 : i32
    %c0_i32_7 = arith.constant 0 : i32
    %16 = tpu.memref_slice %arg9[%9, %c0_i32_6, %c0_i32_7] : memref<2x20x128xf32, #tpu.memory_space<vmem>> -> memref<1x20x128xf32, #tpu.memory_space<vmem>>
    %17 = tpu.memref_squeeze %16 : memref<1x20x128xf32, #tpu.memory_space<vmem>> -> memref<20x128xf32, #tpu.memory_space<vmem>>
    %18 = tpu.memref_slice %arg10[%9] : memref<2x!tpu.dma_semaphore, #tpu.memory_space<semaphore_mem>> -> memref<1x!tpu.dma_semaphore, #tpu.memory_space<semaphore_mem>>
    %19 = tpu.memref_squeeze %18 : memref<1x!tpu.dma_semaphore, #tpu.memory_space<semaphore_mem>> -> memref<!tpu.dma_semaphore, #tpu.memory_space<semaphore_mem>>
    tpu.wait_dma2 semaphore(%19 : memref<!tpu.dma_semaphore, #tpu.memory_space<semaphore_mem>>) src(%15 : memref<20x128xf32, #tpu.memory_space<any>>) dst(%17 : memref<20x128xf32, #tpu.memory_space<vmem>>)
    %c1_i32_8 = arith.constant 1 : i32
    %20 = arith.addi %arg1, %c1_i32_8 : i32
    %c4_i32 = arith.constant 4 : i32
    %21 = arith.cmpi slt, %20, %c4_i32 : i32
    %22 = arith.extui %21 : i1 to i32
    %c0_i32_9 = arith.constant 0 : i32
    %23 = arith.cmpi ne, %22, %c0_i32_9 : i32
    scf.if %23 {
      %c1_i32_43 = arith.constant 1 : i32
      %96 = arith.addi %arg1, %c1_i32_43 : i32
      %c1_i32_44 = arith.constant 1 : i32
      %97 = arith.subi %c1_i32_44, %9 : i32
      %c16_i32_45 = arith.constant 16 : i32
      %98 = arith.muli %96, %c16_i32_45 : i32
      %c0_i32_46 = arith.constant 0 : i32
      %99 = tpu.memref_slice %arg2[%arg0, %98, %c0_i32_46] : memref<2x68x128xf32, #tpu.memory_space<any>> -> memref<1x20x128xf32, #tpu.memory_space<any>>
      %100 = tpu.memref_squeeze %99 : memref<1x20x128xf32, #tpu.memory_space<any>> -> memref<20x128xf32, #tpu.memory_space<any>>
      %c0_i32_47 = arith.constant 0 : i32
      %c0_i32_48 = arith.constant 0 : i32
      %101 = tpu.memref_slice %arg9[%97, %c0_i32_47, %c0_i32_48] : memref<2x20x128xf32, #tpu.memory_space<vmem>> -> memref<1x20x128xf32, #tpu.memory_space<vmem>>
      %102 = tpu.memref_squeeze %101 : memref<1x20x128xf32, #tpu.memory_space<vmem>> -> memref<20x128xf32, #tpu.memory_space<vmem>>
      %103 = tpu.memref_slice %arg10[%97] : memref<2x!tpu.dma_semaphore, #tpu.memory_space<semaphore_mem>> -> memref<1x!tpu.dma_semaphore, #tpu.memory_space<semaphore_mem>>
      %104 = tpu.memref_squeeze %103 : memref<1x!tpu.dma_semaphore, #tpu.memory_space<semaphore_mem>> -> memref<!tpu.dma_semaphore, #tpu.memory_space<semaphore_mem>>
      tpu.enqueue_dma source(%100 : memref<20x128xf32, #tpu.memory_space<any>>) target(%102 : memref<20x128xf32, #tpu.memory_space<vmem>>) target_semaphore(%104 : memref<!tpu.dma_semaphore, #tpu.memory_space<semaphore_mem>>)
    } else {
    }
    %24 = arith.index_cast %9 : i32 to index
    %c0 = arith.constant 0 : index
    %c0_10 = arith.constant 0 : index
    %25 = vector.load %arg9[%24, %c0, %c0_10] : memref<2x20x128xf32, #tpu.memory_space<vmem>>, vector<1x20x128xf32>
    %26 = vector.shape_cast %25 : vector<1x20x128xf32> to vector<20x128xf32>
    %c0_11 = arith.constant 0 : index
    %c0_12 = arith.constant 0 : index
    %27 = vector.load %arg3[%c0_11, %c0_12] : memref<1x128xf32, #tpu.memory_space<vmem>>, vector<1x128xf32>
    %28 = vector.broadcast %27 : vector<1x128xf32> to vector<20x128xf32>
    %29 = arith.mulf %26, %28 : vector<20x128xf32>
    %c0_13 = arith.constant 0 : index
    %c0_14 = arith.constant 0 : index
    %30 = vector.load %arg4[%c0_13, %c0_14] : memref<1x128xf32, #tpu.memory_space<vmem>>, vector<1x128xf32>
    %31 = vector.broadcast %30 : vector<1x128xf32> to vector<20x128xf32>
    %32 = arith.addf %29, %31 : vector<20x128xf32>
    %cst = arith.constant 0.000000e+00 : f32
    %33 = vector.broadcast %cst : f32 to vector<20x128xf32>
    %34 = arith.cmpf ogt, %32, %33 : vector<20x128xf32>
    %cst_15 = arith.constant 3.000000e-01 : f32
    %35 = vector.broadcast %cst_15 : f32 to vector<20x128xf32>
    %36 = arith.mulf %35, %32 : vector<20x128xf32>
    %37 = arith.select %34, %32, %36 : vector<20x128xi1>, vector<20x128xf32>
    %c16_i32_16 = arith.constant 16 : i32
    %38 = arith.muli %arg1, %c16_i32_16 : i32
    %c2_i32_17 = arith.constant 2 : i32
    %39 = arith.subi %38, %c2_i32_17 : i32
    %40 = tpu.iota {dimensions = array<i32: 0>} : vector<20x1xi32>
    %41 = vector.broadcast %39 : i32 to vector<20x1xi32>
    %42 = arith.addi %41, %40 : vector<20x1xi32>
    %c0_i32_18 = arith.constant 0 : i32
    %43 = vector.broadcast %c0_i32_18 : i32 to vector<20x1xi32>
    %44 = arith.cmpi sge, %42, %43 : vector<20x1xi32>
    %c64_i32 = arith.constant 64 : i32
    %45 = vector.broadcast %c64_i32 : i32 to vector<20x1xi32>
    %46 = arith.cmpi slt, %42, %45 : vector<20x1xi32>
    %47 = arith.andi %44, %46 : vector<20x1xi1>
    %cst_19 = arith.constant 0.000000e+00 : f32
    %48 = vector.shape_cast %47 : vector<20x1xi1> to vector<20x1xi1>
    %49 = vector.broadcast %48 : vector<20x1xi1> to vector<20x128xi1>
    %50 = vector.broadcast %cst_19 : f32 to vector<20x128xf32>
    %51 = arith.select %49, %37, %50 : vector<20x128xi1>, vector<20x128xf32>
    %52 = arith.truncf %51 : vector<20x128xf32> to vector<20x128xbf16>
    %53 = vector.extract_strided_slice %52 {offsets = [0, 0], sizes = [18, 128], strides = [1, 1]} : vector<20x128xbf16> to vector<18x128xbf16>
    %54 = vector.extract_strided_slice %52 {offsets = [1, 0], sizes = [18, 128], strides = [1, 1]} : vector<20x128xbf16> to vector<18x128xbf16>
    %55 = vector.extract_strided_slice %52 {offsets = [2, 0], sizes = [18, 128], strides = [1, 1]} : vector<20x128xbf16> to vector<18x128xbf16>
    %56 = tpu.concatenate %53, %54, %55 in 1 : vector<18x128xbf16>, vector<18x128xbf16>, vector<18x128xbf16> -> vector<18x384xbf16>
    %c0_20 = arith.constant 0 : index
    %c0_21 = arith.constant 0 : index
    %57 = vector.load %arg5[%c0_20, %c0_21] : memref<384x128xbf16, #tpu.memory_space<vmem>>, vector<384x128xbf16>
    %cst_22 = arith.constant dense<0.000000e+00> : vector<18x128xf32>
    %58 = tpu.matmul %56, %57, %cst_22 {dimension_numbers = #tpu.dot_dimension_numbers<[1], [0], [0], [1], [0, 0, 1, 1], [], []>} : vector<18x384xbf16>, vector<384x128xbf16>, vector<18x128xf32> -> vector<18x128xf32>
    %c0_23 = arith.constant 0 : index
    %c0_24 = arith.constant 0 : index
    %59 = vector.load %arg6[%c0_23, %c0_24] : memref<1x128xf32, #tpu.memory_space<vmem>>, vector<1x128xf32>
    %60 = vector.broadcast %59 : vector<1x128xf32> to vector<18x128xf32>
    %61 = arith.addf %58, %60 : vector<18x128xf32>
    %62 = arith.truncf %61 : vector<18x128xf32> to vector<18x128xbf16>
    %c0_25 = arith.constant 0 : index
    %c0_26 = arith.constant 0 : index
    %c0_27 = arith.constant 0 : index
    %c0_28 = arith.constant 0 : index
    %63 = vector.load %arg7[%c0_25, %c0_26, %c0_27, %c0_28] : memref<1x1x18x128xbf16, #tpu.memory_space<vmem>>, vector<1x1x18x128xbf16>
    %64 = vector.shape_cast %63 : vector<1x1x18x128xbf16> to vector<18x128xbf16>
    %65 = vector.shape_cast %62 : vector<18x128xbf16> to vector<1x1x18x128xbf16>
    tpu.vector_store %arg7[%c0_25, %c0_26, %c0_27, %c0_28], %65 {strides = array<i32>} : memref<1x1x18x128xbf16, #tpu.memory_space<vmem>>, vector<1x1x18x128xbf16>,
    %66 = tpu.iota {dimensions = array<i32: 0>} : vector<18x1xi32>
    %c1_i32_29 = arith.constant 1 : i32
    %67 = vector.broadcast %c1_i32_29 : i32 to vector<18x1xi32>
    %68 = arith.cmpi sge, %66, %67 : vector<18x1xi32>
    %c17_i32 = arith.constant 17 : i32
    %69 = vector.broadcast %c17_i32 : i32 to vector<18x1xi32>
    %70 = arith.cmpi slt, %66, %69 : vector<18x1xi32>
    %71 = arith.andi %68, %70 : vector<18x1xi1>
    %c16_i32_30 = arith.constant 16 : i32
    %72 = arith.muli %arg1, %c16_i32_30 : i32
    %c1_i32_31 = arith.constant 1 : i32
    %73 = arith.subi %72, %c1_i32_31 : i32
    %74 = vector.broadcast %73 : i32 to vector<18x1xi32>
    %75 = arith.addi %74, %66 : vector<18x1xi32>
    %c64_i32_32 = arith.constant 64 : i32
    %76 = vector.broadcast %c64_i32_32 : i32 to vector<18x1xi32>
    %77 = arith.cmpi slt, %75, %76 : vector<18x1xi32>
    %78 = arith.andi %71, %77 : vector<18x1xi1>
    %79 = arith.extui %78 : vector<18x1xi1> to vector<18x1xi32>
    %80 = arith.sitofp %79 : vector<18x1xi32> to vector<18x1xf32>
    %81 = vector.broadcast %80 : vector<18x1xf32> to vector<18x128xf32>
    %82 = arith.mulf %61, %81 : vector<18x128xf32>
    %cst_33 = arith.constant dense<0.000000e+00> : vector<128xf32>
    %83 = vector.multi_reduction <add>, %82, %cst_33 [0] : vector<18x128xf32> to vector<128xf32>
    %84 = vector.shape_cast %83 : vector<128xf32> to vector<1x128xf32>
    %85 = arith.mulf %82, %82 : vector<18x128xf32>
    %cst_34 = arith.constant dense<0.000000e+00> : vector<128xf32>
    %86 = vector.multi_reduction <add>, %85, %cst_34 [0] : vector<18x128xf32> to vector<128xf32>
    %87 = vector.shape_cast %86 : vector<128xf32> to vector<1x128xf32>
    %c0_i32_35 = arith.constant 0 : i32
    %88 = arith.cmpi eq, %arg1, %c0_i32_35 : i32
    %89 = arith.extui %88 : i1 to i32
    %c0_i32_36 = arith.constant 0 : i32
    %90 = arith.cmpi ne, %89, %c0_i32_36 : i32
    scf.if %90 {
      %cst_43 = arith.constant 0.000000e+00 : f32
      %96 = vector.broadcast %cst_43 : f32 to vector<1x2x128xf32>
      %c0_44 = arith.constant 0 : index
      %c0_45 = arith.constant 0 : index
      %c0_46 = arith.constant 0 : index
      %97 = vector.load %arg8[%c0_44, %c0_45, %c0_46] : memref<1x2x128xf32, #tpu.memory_space<vmem>>, vector<1x2x128xf32>
      tpu.vector_store %arg8[%c0_44, %c0_45, %c0_46], %96 {strides = array<i32>} : memref<1x2x128xf32, #tpu.memory_space<vmem>>, vector<1x2x128xf32>,
    } else {
    }
    %c0_37 = arith.constant 0 : index
    %c0_38 = arith.constant 0 : index
    %c0_39 = arith.constant 0 : index
    %91 = vector.load %arg8[%c0_37, %c0_38, %c0_39] : memref<1x2x128xf32, #tpu.memory_space<vmem>>, vector<1x2x128xf32>
    %92 = tpu.concatenate %84, %87 in 0 : vector<1x128xf32>, vector<1x128xf32> -> vector<2x128xf32>
    %93 = vector.shape_cast %92 : vector<2x128xf32> to vector<1x2x128xf32>
    %94 = arith.addf %91, %93 : vector<1x2x128xf32>
    %c0_40 = arith.constant 0 : index
    %c0_41 = arith.constant 0 : index
    %c0_42 = arith.constant 0 : index
    %95 = vector.load %arg8[%c0_40, %c0_41, %c0_42] : memref<1x2x128xf32, #tpu.memory_space<vmem>>, vector<1x2x128xf32>
    tpu.vector_store %arg8[%c0_40, %c0_41, %c0_42], %94 {strides = array<i32>} : memref<1x2x128xf32, #tpu.memory_space<vmem>>, vector<1x2x128xf32>,
    return
  }
  func.func @transform_1(%arg0: i32, %arg1: i32) -> (i32, i32) {
    %c0_i32 = arith.constant 0 : i32
    %c0_i32_0 = arith.constant 0 : i32
    %c0_i32_1 = arith.constant 0 : i32
    return %c0_i32, %c0_i32_0 : i32, i32
  }
  func.func @transform_2(%arg0: i32, %arg1: i32) -> (i32, i32) {
    %c0_i32 = arith.constant 0 : i32
    %c0_i32_0 = arith.constant 0 : i32
    %c0_i32_1 = arith.constant 0 : i32
    return %c0_i32, %c0_i32_0 : i32, i32
  }
  func.func @transform_3(%arg0: i32, %arg1: i32) -> (i32, i32) {
    %c0_i32 = arith.constant 0 : i32
    %c0_i32_0 = arith.constant 0 : i32
    %c0_i32_1 = arith.constant 0 : i32
    return %c0_i32, %c0_i32_0 : i32, i32
  }
  func.func @transform_4(%arg0: i32, %arg1: i32) -> (i32, i32) {
    %c0_i32 = arith.constant 0 : i32
    %c0_i32_0 = arith.constant 0 : i32
    %c0_i32_1 = arith.constant 0 : i32
    return %c0_i32, %c0_i32_0 : i32, i32
  }
  func.func @transform_5(%arg0: i32, %arg1: i32) -> (i32, i32, i32, i32) {
    %c0_i32 = arith.constant 0 : i32
    %c0_i32_0 = arith.constant 0 : i32
    %c0_i32_1 = arith.constant 0 : i32
    return %arg0, %arg1, %c0_i32, %c0_i32_0 : i32, i32, i32, i32
  }
  func.func @transform_6(%arg0: i32, %arg1: i32) -> (i32, i32, i32) {
    %c0_i32 = arith.constant 0 : i32
    %c0_i32_0 = arith.constant 0 : i32
    %c0_i32_1 = arith.constant 0 : i32
    return %arg0, %c0_i32, %c0_i32_0 : i32, i32, i32
  }
}

module attributes {stable_mosaic.version = 11 : i64} {
  func.func @_stage2_kernel(%arg0: i32, %arg1: i32, %arg2: memref<2x68x128xf32, #tpu.memory_space<any>>, %arg3: memref<1x1x18x128xbf16, #tpu.memory_space<vmem>>, %arg4: memref<1x128xf32, #tpu.memory_space<vmem>>, %arg5: memref<1x128xf32, #tpu.memory_space<vmem>>, %arg6: memref<384x128xbf16, #tpu.memory_space<vmem>>, %arg7: memref<1x128xf32, #tpu.memory_space<vmem>>, %arg8: memref<128x128xbf16, #tpu.memory_space<vmem>>, %arg9: memref<1x128xf32, #tpu.memory_space<vmem>>, %arg10: memref<1x8x128xf32, #tpu.memory_space<vmem>>, %arg11: memref<1x1x128xf32, #tpu.memory_space<vmem>>, %arg12: memref<2x16x128xf32, #tpu.memory_space<vmem>>, %arg13: memref<2x!tpu.dma_semaphore, #tpu.memory_space<semaphore_mem>>, %arg14: memref<16x128xf32, #tpu.memory_space<vmem>>) attributes {dimension_semantics = [#tpu.dimension_semantics<parallel>, #tpu.dimension_semantics<arbitrary>], iteration_bounds = array<i64: 2, 4>, scalar_prefetch = 0 : i64, scratch_operands = 3 : i64, tpu.core_type = #tpu.core_type<tc>, window_params = [{}, {transform_indices = @transform_1, window_bounds = array<i64: 1, 1, 18, 128>}, {pipeline_mode = #tpu.pipeline_mode<synchronous>, transform_indices = @transform_2, window_bounds = array<i64: 1, 128>}, {pipeline_mode = #tpu.pipeline_mode<synchronous>, transform_indices = @transform_3, window_bounds = array<i64: 1, 128>}, {pipeline_mode = #tpu.pipeline_mode<synchronous>, transform_indices = @transform_4, window_bounds = array<i64: 384, 128>}, {pipeline_mode = #tpu.pipeline_mode<synchronous>, transform_indices = @transform_5, window_bounds = array<i64: 1, 128>}, {pipeline_mode = #tpu.pipeline_mode<synchronous>, transform_indices = @transform_6, window_bounds = array<i64: 128, 128>}, {pipeline_mode = #tpu.pipeline_mode<synchronous>, transform_indices = @transform_7, window_bounds = array<i64: 1, 128>}, {transform_indices = @transform_8, window_bounds = array<i64: 1, 8, 128>}, {transform_indices = @transform_9, window_bounds = array<i64: 1, 1, 128>}]} {
    %c2_i32 = arith.constant 2 : i32
    %c0_i32 = arith.constant 0 : i32
    %0 = arith.cmpi eq, %c2_i32, %c0_i32 : i32
    %c1_i32 = arith.constant 1 : i32
    %1 = arith.select %0, %c1_i32, %c2_i32 : i32
    %2 = arith.remsi %arg1, %1 : i32
    %c0_i32_0 = arith.constant 0 : i32
    %3 = arith.cmpi ne, %2, %c0_i32_0 : i32
    %c0_i32_1 = arith.constant 0 : i32
    %4 = arith.cmpi slt, %2, %c0_i32_1 : i32
    %c0_i32_2 = arith.constant 0 : i32
    %5 = arith.cmpi slt, %1, %c0_i32_2 : i32
    %6 = arith.xori %4, %5 : i1
    %7 = arith.andi %6, %3 : i1
    %8 = arith.addi %2, %1 : i32
    %9 = arith.select %7, %8, %2 : i32
    %c0_i32_3 = arith.constant 0 : i32
    %10 = arith.cmpi eq, %arg1, %c0_i32_3 : i32
    %11 = arith.extui %10 : i1 to i32
    %c0_i32_4 = arith.constant 0 : i32
    %12 = arith.cmpi ne, %11, %c0_i32_4 : i32
    scf.if %12 {
      %c0_i32_52 = arith.constant 0 : i32
      %c0_i32_53 = arith.constant 0 : i32
      %c2_i32_54 = arith.constant 2 : i32
      %c0_i32_55 = arith.constant 0 : i32
      %99 = tpu.memref_slice %arg2[%arg0, %c2_i32_54, %c0_i32_55] : memref<2x68x128xf32, #tpu.memory_space<any>> -> memref<1x16x128xf32, #tpu.memory_space<any>>
      %100 = tpu.memref_squeeze %99 : memref<1x16x128xf32, #tpu.memory_space<any>> -> memref<16x128xf32, #tpu.memory_space<any>>
      %c0_i32_56 = arith.constant 0 : i32
      %c0_i32_57 = arith.constant 0 : i32
      %101 = tpu.memref_slice %arg12[%c0_i32_52, %c0_i32_56, %c0_i32_57] : memref<2x16x128xf32, #tpu.memory_space<vmem>> -> memref<1x16x128xf32, #tpu.memory_space<vmem>>
      %102 = tpu.memref_squeeze %101 : memref<1x16x128xf32, #tpu.memory_space<vmem>> -> memref<16x128xf32, #tpu.memory_space<vmem>>
      %103 = tpu.memref_slice %arg13[%c0_i32_53] : memref<2x!tpu.dma_semaphore, #tpu.memory_space<semaphore_mem>> -> memref<1x!tpu.dma_semaphore, #tpu.memory_space<semaphore_mem>>
      %104 = tpu.memref_squeeze %103 : memref<1x!tpu.dma_semaphore, #tpu.memory_space<semaphore_mem>> -> memref<!tpu.dma_semaphore, #tpu.memory_space<semaphore_mem>>
      tpu.enqueue_dma source(%100 : memref<16x128xf32, #tpu.memory_space<any>>) target(%102 : memref<16x128xf32, #tpu.memory_space<vmem>>) target_semaphore(%104 : memref<!tpu.dma_semaphore, #tpu.memory_space<semaphore_mem>>)
    } else {
    }
    %c16_i32 = arith.constant 16 : i32
    %13 = arith.muli %arg1, %c16_i32 : i32
    %c2_i32_5 = arith.constant 2 : i32
    %14 = arith.addi %c2_i32_5, %13 : i32
    %c0_i32_6 = arith.constant 0 : i32
    %15 = tpu.memref_slice %arg2[%arg0, %14, %c0_i32_6] : memref<2x68x128xf32, #tpu.memory_space<any>> -> memref<1x16x128xf32, #tpu.memory_space<any>>
    %16 = tpu.memref_squeeze %15 : memref<1x16x128xf32, #tpu.memory_space<any>> -> memref<16x128xf32, #tpu.memory_space<any>>
    %c0_i32_7 = arith.constant 0 : i32
    %c0_i32_8 = arith.constant 0 : i32
    %17 = tpu.memref_slice %arg12[%9, %c0_i32_7, %c0_i32_8] : memref<2x16x128xf32, #tpu.memory_space<vmem>> -> memref<1x16x128xf32, #tpu.memory_space<vmem>>
    %18 = tpu.memref_squeeze %17 : memref<1x16x128xf32, #tpu.memory_space<vmem>> -> memref<16x128xf32, #tpu.memory_space<vmem>>
    %19 = tpu.memref_slice %arg13[%9] : memref<2x!tpu.dma_semaphore, #tpu.memory_space<semaphore_mem>> -> memref<1x!tpu.dma_semaphore, #tpu.memory_space<semaphore_mem>>
    %20 = tpu.memref_squeeze %19 : memref<1x!tpu.dma_semaphore, #tpu.memory_space<semaphore_mem>> -> memref<!tpu.dma_semaphore, #tpu.memory_space<semaphore_mem>>
    tpu.wait_dma2 semaphore(%20 : memref<!tpu.dma_semaphore, #tpu.memory_space<semaphore_mem>>) src(%16 : memref<16x128xf32, #tpu.memory_space<any>>) dst(%18 : memref<16x128xf32, #tpu.memory_space<vmem>>)
    %c1_i32_9 = arith.constant 1 : i32
    %21 = arith.addi %arg1, %c1_i32_9 : i32
    %c4_i32 = arith.constant 4 : i32
    %22 = arith.cmpi slt, %21, %c4_i32 : i32
    %23 = arith.extui %22 : i1 to i32
    %c0_i32_10 = arith.constant 0 : i32
    %24 = arith.cmpi ne, %23, %c0_i32_10 : i32
    scf.if %24 {
      %c1_i32_52 = arith.constant 1 : i32
      %99 = arith.addi %arg1, %c1_i32_52 : i32
      %c1_i32_53 = arith.constant 1 : i32
      %100 = arith.subi %c1_i32_53, %9 : i32
      %c16_i32_54 = arith.constant 16 : i32
      %101 = arith.muli %99, %c16_i32_54 : i32
      %c2_i32_55 = arith.constant 2 : i32
      %102 = arith.addi %c2_i32_55, %101 : i32
      %c0_i32_56 = arith.constant 0 : i32
      %103 = tpu.memref_slice %arg2[%arg0, %102, %c0_i32_56] : memref<2x68x128xf32, #tpu.memory_space<any>> -> memref<1x16x128xf32, #tpu.memory_space<any>>
      %104 = tpu.memref_squeeze %103 : memref<1x16x128xf32, #tpu.memory_space<any>> -> memref<16x128xf32, #tpu.memory_space<any>>
      %c0_i32_57 = arith.constant 0 : i32
      %c0_i32_58 = arith.constant 0 : i32
      %105 = tpu.memref_slice %arg12[%100, %c0_i32_57, %c0_i32_58] : memref<2x16x128xf32, #tpu.memory_space<vmem>> -> memref<1x16x128xf32, #tpu.memory_space<vmem>>
      %106 = tpu.memref_squeeze %105 : memref<1x16x128xf32, #tpu.memory_space<vmem>> -> memref<16x128xf32, #tpu.memory_space<vmem>>
      %107 = tpu.memref_slice %arg13[%100] : memref<2x!tpu.dma_semaphore, #tpu.memory_space<semaphore_mem>> -> memref<1x!tpu.dma_semaphore, #tpu.memory_space<semaphore_mem>>
      %108 = tpu.memref_squeeze %107 : memref<1x!tpu.dma_semaphore, #tpu.memory_space<semaphore_mem>> -> memref<!tpu.dma_semaphore, #tpu.memory_space<semaphore_mem>>
      tpu.enqueue_dma source(%104 : memref<16x128xf32, #tpu.memory_space<any>>) target(%106 : memref<16x128xf32, #tpu.memory_space<vmem>>) target_semaphore(%108 : memref<!tpu.dma_semaphore, #tpu.memory_space<semaphore_mem>>)
    } else {
    }
    %c0 = arith.constant 0 : index
    %c0_11 = arith.constant 0 : index
    %c0_12 = arith.constant 0 : index
    %c0_13 = arith.constant 0 : index
    %25 = vector.load %arg3[%c0, %c0_11, %c0_12, %c0_13] : memref<1x1x18x128xbf16, #tpu.memory_space<vmem>>, vector<1x1x18x128xbf16>
    %26 = vector.shape_cast %25 : vector<1x1x18x128xbf16> to vector<18x128xbf16>
    %27 = arith.extf %26 : vector<18x128xbf16> to vector<18x128xf32>
    %c0_14 = arith.constant 0 : index
    %c0_15 = arith.constant 0 : index
    %28 = vector.load %arg4[%c0_14, %c0_15] : memref<1x128xf32, #tpu.memory_space<vmem>>, vector<1x128xf32>
    %29 = vector.broadcast %28 : vector<1x128xf32> to vector<18x128xf32>
    %30 = arith.mulf %27, %29 : vector<18x128xf32>
    %c0_16 = arith.constant 0 : index
    %c0_17 = arith.constant 0 : index
    %31 = vector.load %arg5[%c0_16, %c0_17] : memref<1x128xf32, #tpu.memory_space<vmem>>, vector<1x128xf32>
    %32 = vector.broadcast %31 : vector<1x128xf32> to vector<18x128xf32>
    %33 = arith.addf %30, %32 : vector<18x128xf32>
    %cst = arith.constant 0.000000e+00 : f32
    %34 = vector.broadcast %cst : f32 to vector<18x128xf32>
    %35 = arith.cmpf ogt, %33, %34 : vector<18x128xf32>
    %cst_18 = arith.constant 3.000000e-01 : f32
    %36 = vector.broadcast %cst_18 : f32 to vector<18x128xf32>
    %37 = arith.mulf %36, %33 : vector<18x128xf32>
    %38 = arith.select %35, %33, %37 : vector<18x128xi1>, vector<18x128xf32>
    %c16_i32_19 = arith.constant 16 : i32
    %39 = arith.muli %arg1, %c16_i32_19 : i32
    %c1_i32_20 = arith.constant 1 : i32
    %40 = arith.subi %39, %c1_i32_20 : i32
    %41 = tpu.iota {dimensions = array<i32: 0>} : vector<18x1xi32>
    %42 = vector.broadcast %40 : i32 to vector<18x1xi32>
    %43 = arith.addi %42, %41 : vector<18x1xi32>
    %c0_i32_21 = arith.constant 0 : i32
    %44 = vector.broadcast %c0_i32_21 : i32 to vector<18x1xi32>
    %45 = arith.cmpi sge, %43, %44 : vector<18x1xi32>
    %c64_i32 = arith.constant 64 : i32
    %46 = vector.broadcast %c64_i32 : i32 to vector<18x1xi32>
    %47 = arith.cmpi slt, %43, %46 : vector<18x1xi32>
    %48 = arith.andi %45, %47 : vector<18x1xi1>
    %cst_22 = arith.constant 0.000000e+00 : f32
    %49 = vector.shape_cast %48 : vector<18x1xi1> to vector<18x1xi1>
    %50 = vector.broadcast %49 : vector<18x1xi1> to vector<18x128xi1>
    %51 = vector.broadcast %cst_22 : f32 to vector<18x128xf32>
    %52 = arith.select %50, %38, %51 : vector<18x128xi1>, vector<18x128xf32>
    %53 = arith.truncf %52 : vector<18x128xf32> to vector<18x128xbf16>
    %54 = vector.extract_strided_slice %53 {offsets = [0, 0], sizes = [16, 128], strides = [1, 1]} : vector<18x128xbf16> to vector<16x128xbf16>
    %55 = vector.extract_strided_slice %53 {offsets = [1, 0], sizes = [16, 128], strides = [1, 1]} : vector<18x128xbf16> to vector<16x128xbf16>
    %56 = vector.extract_strided_slice %53 {offsets = [2, 0], sizes = [16, 128], strides = [1, 1]} : vector<18x128xbf16> to vector<16x128xbf16>
    %57 = tpu.concatenate %54, %55, %56 in 1 : vector<16x128xbf16>, vector<16x128xbf16>, vector<16x128xbf16> -> vector<16x384xbf16>
    %c0_23 = arith.constant 0 : index
    %c0_24 = arith.constant 0 : index
    %58 = vector.load %arg6[%c0_23, %c0_24] : memref<384x128xbf16, #tpu.memory_space<vmem>>, vector<384x128xbf16>
    %cst_25 = arith.constant dense<0.000000e+00> : vector<16x128xf32>
    %59 = tpu.matmul %57, %58, %cst_25 {dimension_numbers = #tpu.dot_dimension_numbers<[1], [0], [0], [1], [0, 0, 1, 1], [], []>} : vector<16x384xbf16>, vector<384x128xbf16>, vector<16x128xf32> -> vector<16x128xf32>
    %c0_26 = arith.constant 0 : index
    %c0_27 = arith.constant 0 : index
    %60 = vector.load %arg7[%c0_26, %c0_27] : memref<1x128xf32, #tpu.memory_space<vmem>>, vector<1x128xf32>
    %61 = vector.broadcast %60 : vector<1x128xf32> to vector<16x128xf32>
    %62 = arith.addf %59, %61 : vector<16x128xf32>
    %63 = arith.index_cast %9 : i32 to index
    %c0_28 = arith.constant 0 : index
    %c0_29 = arith.constant 0 : index
    %64 = vector.load %arg12[%63, %c0_28, %c0_29] : memref<2x16x128xf32, #tpu.memory_space<vmem>>, vector<1x16x128xf32>
    %65 = vector.shape_cast %64 : vector<1x16x128xf32> to vector<16x128xf32>
    %66 = arith.truncf %65 : vector<16x128xf32> to vector<16x128xbf16>
    %c0_30 = arith.constant 0 : index
    %c0_31 = arith.constant 0 : index
    %67 = vector.load %arg8[%c0_30, %c0_31] : memref<128x128xbf16, #tpu.memory_space<vmem>>, vector<128x128xbf16>
    %cst_32 = arith.constant dense<0.000000e+00> : vector<16x128xf32>
    %68 = tpu.matmul %66, %67, %cst_32 {dimension_numbers = #tpu.dot_dimension_numbers<[1], [0], [0], [1], [0, 0, 1, 1], [], []>} : vector<16x128xbf16>, vector<128x128xbf16>, vector<16x128xf32> -> vector<16x128xf32>
    %c0_33 = arith.constant 0 : index
    %c0_34 = arith.constant 0 : index
    %69 = vector.load %arg9[%c0_33, %c0_34] : memref<1x128xf32, #tpu.memory_space<vmem>>, vector<1x128xf32>
    %70 = vector.broadcast %69 : vector<1x128xf32> to vector<16x128xf32>
    %71 = arith.addf %68, %70 : vector<16x128xf32>
    %72 = arith.addf %71, %62 : vector<16x128xf32>
    %c0_35 = arith.constant 0 : index
    %c0_36 = arith.constant 0 : index
    %73 = vector.load %arg14[%c0_35, %c0_36] : memref<16x128xf32, #tpu.memory_space<vmem>>, vector<16x128xf32>
    tpu.vector_store %arg14[%c0_35, %c0_36], %72 {strides = array<i32>} : memref<16x128xf32, #tpu.memory_space<vmem>>, vector<16x128xf32>,
    %c0_37 = arith.constant 0 : index
    %c0_38 = arith.constant 0 : index
    %74 = tpu.strided_load %arg14[%c0_37, %c0_38] {strides = array<i32: 2, 1>} : memref<16x128xf32, #tpu.memory_space<vmem>>, vector<8x128xf32>
    %c1 = arith.constant 1 : index
    %c0_39 = arith.constant 0 : index
    %75 = tpu.strided_load %arg14[%c1, %c0_39] {strides = array<i32: 2, 1>} : memref<16x128xf32, #tpu.memory_space<vmem>>, vector<8x128xf32>
    %76 = arith.maximumf %74, %75 : vector<8x128xf32>
    %c0_40 = arith.constant 0 : index
    %c0_41 = arith.constant 0 : index
    %c0_42 = arith.constant 0 : index
    %77 = vector.load %arg10[%c0_40, %c0_41, %c0_42] : memref<1x8x128xf32, #tpu.memory_space<vmem>>, vector<1x8x128xf32>
    %78 = vector.shape_cast %77 : vector<1x8x128xf32> to vector<8x128xf32>
    %79 = vector.shape_cast %76 : vector<8x128xf32> to vector<1x8x128xf32>
    tpu.vector_store %arg10[%c0_40, %c0_41, %c0_42], %79 {strides = array<i32>} : memref<1x8x128xf32, #tpu.memory_space<vmem>>, vector<1x8x128xf32>,
    %c8_i32 = arith.constant 8 : i32
    %80 = arith.muli %arg1, %c8_i32 : i32
    %81 = tpu.iota {dimensions = array<i32: 0>} : vector<8x1xi32>
    %82 = vector.broadcast %80 : i32 to vector<8x1xi32>
    %83 = arith.addi %82, %81 : vector<8x1xi32>
    %c32_i32 = arith.constant 32 : i32
    %84 = vector.broadcast %c32_i32 : i32 to vector<8x1xi32>
    %85 = arith.cmpi slt, %83, %84 : vector<8x1xi32>
    %86 = arith.extui %85 : vector<8x1xi1> to vector<8x1xi32>
    %87 = arith.sitofp %86 : vector<8x1xi32> to vector<8x1xf32>
    %88 = vector.broadcast %87 : vector<8x1xf32> to vector<8x128xf32>
    %89 = arith.mulf %76, %88 : vector<8x128xf32>
    %cst_43 = arith.constant dense<0.000000e+00> : vector<128xf32>
    %90 = vector.multi_reduction <add>, %89, %cst_43 [0] : vector<8x128xf32> to vector<128xf32>
    %91 = vector.shape_cast %90 : vector<128xf32> to vector<1x128xf32>
    %c0_i32_44 = arith.constant 0 : i32
    %92 = arith.cmpi eq, %arg1, %c0_i32_44 : i32
    %93 = arith.extui %92 : i1 to i32
    %c0_i32_45 = arith.constant 0 : i32
    %94 = arith.cmpi ne, %93, %c0_i32_45 : i32
    scf.if %94 {
      %cst_52 = arith.constant 0.000000e+00 : f32
      %99 = vector.broadcast %cst_52 : f32 to vector<1x1x128xf32>
      %c0_53 = arith.constant 0 : index
      %c0_54 = arith.constant 0 : index
      %c0_55 = arith.constant 0 : index
      %100 = vector.load %arg11[%c0_53, %c0_54, %c0_55] : memref<1x1x128xf32, #tpu.memory_space<vmem>>, vector<1x1x128xf32>
      tpu.vector_store %arg11[%c0_53, %c0_54, %c0_55], %99 {strides = array<i32>} : memref<1x1x128xf32, #tpu.memory_space<vmem>>, vector<1x1x128xf32>,
    } else {
    }
    %c0_46 = arith.constant 0 : index
    %c0_47 = arith.constant 0 : index
    %c0_48 = arith.constant 0 : index
    %95 = vector.load %arg11[%c0_46, %c0_47, %c0_48] : memref<1x1x128xf32, #tpu.memory_space<vmem>>, vector<1x1x128xf32>
    %96 = vector.shape_cast %91 : vector<1x128xf32> to vector<1x1x128xf32>
    %97 = arith.addf %95, %96 : vector<1x1x128xf32>
    %c0_49 = arith.constant 0 : index
    %c0_50 = arith.constant 0 : index
    %c0_51 = arith.constant 0 : index
    %98 = vector.load %arg11[%c0_49, %c0_50, %c0_51] : memref<1x1x128xf32, #tpu.memory_space<vmem>>, vector<1x1x128xf32>
    tpu.vector_store %arg11[%c0_49, %c0_50, %c0_51], %97 {strides = array<i32>} : memref<1x1x128xf32, #tpu.memory_space<vmem>>, vector<1x1x128xf32>,
    return
  }
  func.func @transform_1(%arg0: i32, %arg1: i32) -> (i32, i32, i32, i32) {
    %c0_i32 = arith.constant 0 : i32
    %c0_i32_0 = arith.constant 0 : i32
    %c0_i32_1 = arith.constant 0 : i32
    return %arg0, %arg1, %c0_i32, %c0_i32_0 : i32, i32, i32, i32
  }
  func.func @transform_2(%arg0: i32, %arg1: i32) -> (i32, i32) {
    %c0_i32 = arith.constant 0 : i32
    %c0_i32_0 = arith.constant 0 : i32
    %c0_i32_1 = arith.constant 0 : i32
    return %c0_i32, %c0_i32_0 : i32, i32
  }
  func.func @transform_3(%arg0: i32, %arg1: i32) -> (i32, i32) {
    %c0_i32 = arith.constant 0 : i32
    %c0_i32_0 = arith.constant 0 : i32
    %c0_i32_1 = arith.constant 0 : i32
    return %c0_i32, %c0_i32_0 : i32, i32
  }
  func.func @transform_4(%arg0: i32, %arg1: i32) -> (i32, i32) {
    %c0_i32 = arith.constant 0 : i32
    %c0_i32_0 = arith.constant 0 : i32
    %c0_i32_1 = arith.constant 0 : i32
    return %c0_i32, %c0_i32_0 : i32, i32
  }
  func.func @transform_5(%arg0: i32, %arg1: i32) -> (i32, i32) {
    %c0_i32 = arith.constant 0 : i32
    %c0_i32_0 = arith.constant 0 : i32
    %c0_i32_1 = arith.constant 0 : i32
    return %c0_i32, %c0_i32_0 : i32, i32
  }
  func.func @transform_6(%arg0: i32, %arg1: i32) -> (i32, i32) {
    %c0_i32 = arith.constant 0 : i32
    %c0_i32_0 = arith.constant 0 : i32
    %c0_i32_1 = arith.constant 0 : i32
    return %c0_i32, %c0_i32_0 : i32, i32
  }
  func.func @transform_7(%arg0: i32, %arg1: i32) -> (i32, i32) {
    %c0_i32 = arith.constant 0 : i32
    %c0_i32_0 = arith.constant 0 : i32
    %c0_i32_1 = arith.constant 0 : i32
    return %c0_i32, %c0_i32_0 : i32, i32
  }
  func.func @transform_8(%arg0: i32, %arg1: i32) -> (i32, i32, i32) {
    %c0_i32 = arith.constant 0 : i32
    %c0_i32_0 = arith.constant 0 : i32
    return %arg0, %arg1, %c0_i32 : i32, i32, i32
  }
  func.func @transform_9(%arg0: i32, %arg1: i32) -> (i32, i32, i32) {
    %c0_i32 = arith.constant 0 : i32
    %c0_i32_0 = arith.constant 0 : i32
    %c0_i32_1 = arith.constant 0 : i32
    return %arg0, %c0_i32, %c0_i32_0 : i32, i32, i32
  }
}

</mosaic_0001>

<bundles_post_ra>
// kernel: resblock_forward.3
= control target key start
LH: loop header
LB: loop body
LE: loop exit
PB: predicated region body
PF: predicated region fallthrough
CT: control target
= control target key end

     0   :  { %s1353_s30 = smov 0   ;;  %s1355_s10 = smov 0   ;;  %s1587_s0 = inlined_call_operand.vmem [shape: f32[2,68,128], index: 0, kind: input, shape index: {}]   ;;  %s1588_s1 = inlined_call_operand.vmem [shape: bf16[2,4,18,128], index: 1, kind: input, shape index: {}]   ;;  %s1589_s2 = inlined_call_operand.vmem [shape: f32[1,128], index: 2, kind: input, shape index: {}]   ;;  %s1590_s3 = inlined_call_operand.vmem [shape: f32[1,128], index: 3, kind: input, shape index: {}]   ;;  %s1591_s4 = inlined_call_operand.vmem [shape: bf16[384,128], index: 4, kind: input, shape index: {}]   ;;  %s1592_s5 = inlined_call_operand.vmem [shape: f32[1,128], index: 5, kind: input, shape index: {}]   ;;  %s1593_s6 = inlined_call_operand.vmem [shape: bf16[128,128], index: 6, kind: input, shape index: {}]   ;;  %s1594_s7 = inlined_call_operand.vmem [shape: f32[1,128], index: 7, kind: input, shape index: {}]   ;;  %s1595_s8 = inlined_call_operand.vmem [shape: f32[2,32,128], index: 8, kind: output, shape index: {0}]   ;;  %s1596_s9 = inlined_call_operand.vmem [shape: f32[2,1,128], index: 9, kind: output, shape index: {1}]  }
   0x1   :  { %1600 = sst [smem:[#allocation13_spill]] %s1594_s7  ;;  %s1357_s11 = smov 0  }
   0x2   :  { %s1359_s12 = smov 0   ;;  %s1361_s13 = smov 0  }
   0x3 LB: > { %1601 = sst [smem:[#allocation8_spill]] %s1291_s11  ;;  %s29_s14 = sadd.s32 1, %s1291_s11  ;;  %s1299_s13 = sphi %s1361_s13, %s20_s13   ;;  %s1295_s12 = sphi %s1359_s12, %s1613_s12   ;;  %s1291_s11 = sphi %s1357_s11, %s1612_s11   ;;  %s1287_s10 = sphi %s1355_s10, %s1611_s10   ;;  %s1283_s30 = sphi %s1353_s30, %s1610_s30  }
   0x4   : > { %1602 = sst [smem:[#allocation9_spill]] %s1295_s12  ;;  %s32_s15 = sadd.s32 1, %s1295_s12 }
   0x5   : > { %1603 = sst [smem:[#allocation10_spill]] %s1299_s13  ;;  %p30_p0 = scmp.ge.s32.totalorder %s29_s14, 4 }
   0x6   : > { %p1022_p1 = scmp.ge.s32.totalorder %s1299_s13, 1  ;;  %p286_p2 = scmp.lt.s32.totalorder %s1299_s13, 9 }
   0x7   : > { %s1615_s14 = smov (%p30_p0, %s29_s14), 0  ;;  %s1617_s15 = smov (!%p30_p0, %s32_s15), %s1295_s12 }
   0x8   : > { %1604 = sst [smem:[#allocation11_spill]] %s1615_s14  ;;  %p287_p3 = pnand %p1022_p1, %p286_p2 }
   0x9   : > { %p34_p4 = scmp.ge.s32.totalorder %s1617_s15, 2  ;;  %p330_p5 = scmp.lt.s32.totalorder (!%p287_p3), %s1287_s10, 1 }
   0xa   : > { %290 = sbr.rel (%p287_p3) target bundleno = 261 (0x105), region = 48  ;;  %p332_p6 = scmp.lt.s32.totalorder (!%p287_p3), %s1283_s30, 3 }
   0xb   : > { %s1619_s15 = smov (%p34_p4, %s1617_s15), 0  ;;  %p350_p7 = scmp.lt.s32.totalorder (!%p287_p3), %s1283_s30, 0 }
   0xc   : > { %1605 = sst [smem:[#allocation12_spill]] %s1619_s15  ;;  %s351_s16 = ssub.s32 (!%p287_p3), 0, %s1283_s30 }
   0xd   : > { %s1026_s12 = smin.u32 (!%p287_p3), %s1283_s30, %s351_s16  ;;  %p1029_p9 = scmp.ne.s32.totalorder (!%p287_p3), %s1283_s30, 0 }
   0xf   : > { %s331_s17 = scalar_select %p330_p5, %s1287_s10, 1 }
  0x10   : > { %s333_s18 = scalar_select %p332_p6, %s1283_s30, 3 }
  0x11   : > { %s1212_s19 = smul.u32 12, %s331_s17  ;;  %s1024_s20 = sshll.u32 %s331_s17, 2 }
  0x12   : > { %s1211_s21 = smul.u32 3, %s333_s18  ;;  %s344_s22 = sadd.s32 %s1024_s20, %s333_s18 }
  0x13   : > { %s1025_s23 = sshll.u32 %s344_s22, 3  ;;  %s1396_s26 = scalar_lea.vmem %s1596_s9, %s331_s17 }
  0x14   : > { %s336_s27 = sadd.s32 %s1212_s19, %s1211_s21  ;;  %s1401_s15 = scalar_lea.vmem %s1595_s8, %s1025_s23 }
  0x15   : > { %s1023_s14 = sshll.u32 %s336_s27, 2  ;;  %s353_s18 = sand.u32 1, %s1026_s12  }
  0x16   : > { %s1407_s7 = scalar_lea.vmem %s1588_s1, %s1023_s14  ;;  %s354_s20 = ssub.s32 0, %s353_s18 }
  0x17   : > { %s1621_s20 = smov (!%p350_p7, %s354_s20), %s353_s18  ;;  %365 = sbr.rel (%p1029_p9) target bundleno = 32 (0x20), region = 52 }
  0x18   : > { %p1028_p8 = scmp.lt.s32.totalorder %s1621_s20, 0  ;;  %s360_s17 = sadd.s32 2, %s1621_s20 }
  0x19   : > { %s946_s16 = smul.u32 (!%p1029_p9), 72, %s1287_s10 }
  0x1a   : > { %s1623_s17 = smov (!%p1028_p8, %s360_s17), %s1621_s20 }
  0x1b   : > { %s947_s11 = scalar_lea.vmem (!%p1029_p9), %s1587_s0, %s946_s16 }
  0x1c   : > { %v1030_v0 = vld [vmem:[%s947_s11 + $0x2] sm:$0xff]  ;;  %v1031_v1 = vld [vmem:[%s947_s11 + $0xa] sm:$0xff] }
  0x1d   : > { %380 = vst [vmem:[#allocation2] sm:$0xff] %v1030_v0 }
  0x1e   : > { %382 = vst [vmem:[#allocation2 + $0x8] sm:$0xff] %v1031_v1 }
  0x1f   : > { %388 = vsyncadd [#allocation3], 256 }
  0x20 PF: > { %s1032_s12 = sshll.u32 %s1283_s30, 4  ;;  %s1033_s13 = sshll.u32 %s1623_s17, 4 }
  0x21   : > { %s1422_s14 = scalar_lea.vmem [#allocation2], %s1033_s13  ;;  %s392_s22 = scalar_lea.sflag [#allocation3], %s1623_s17 }
  0x22   : > { %1279 = dma.done.wait %s392_s22, 256 }
  0x23   : > { %1280 = vsyncadd %s392_s22, 4294967040  ;;  %s396_s23 = sadd.s32 1, %s1283_s30 }
  0x24   : > { %p1034_p10 = scmp.ge.s32.totalorder %s396_s23, 4 }
  0x25   : > { %s401_s24 = ssub.s32 (!%p1034_p10), 1, %s1623_s17  ;;  %s953_s25 = smul.u32 (!%p1034_p10), 72, %s1287_s10 }
  0x26   : > { %400 = sbr.rel (%p1034_p10) target bundleno = 47 (0x2f), region = 75  ;;  %s1036_s27 = sshll.u32 (!%p1034_p10), %s401_s24, 4 }
  0x27   : > { %s954_s28 = sadd.s32 (!%p1034_p10), %s1032_s12, %s953_s25  ;;  %s408_s16 = scalar_lea.vmem (!%p1034_p10), [#allocation2], %s1036_s27 }
  0x28   : > { %s955_s20 = scalar_lea.vmem (!%p1034_p10), %s1587_s0, %s954_s28  ;;  %s409_s19 = scalar_lea.sflag (!%p1034_p10), [#allocation3], %s401_s24 }
  0x2b   : > { %v1037_v2 = vld [vmem:[%s955_s20 + $0x12] sm:$0xff]  ;;  %v1038_v3 = vld [vmem:[%s955_s20 + $0x1a] sm:$0xff] }
  0x2c   : > { %421 = vst [vmem:[%s408_s16] sm:$0xff] %v1037_v2 }
  0x2d   : > { %423 = vst [vmem:[%s408_s16 + $0x8] sm:$0xff] %v1038_v3 }
  0x2e   : > { %429 = vsyncadd %s409_s19, 256 }
  0x2f PF: > { %v1182_v4 = vld [vmem:[%s1591_s4 + $0x38] sm:$0xff]  ;;  %v460_v7 = vlaneseq  ;;  %v1181_v9 = vld [vmem:[%s1591_s4 + $0x30] sm:$0xff]  ;;  %s1039_s18 = sadd.s32 4294967295, %s1032_s12  ;;  %v1180_v15 = vld [vmem:[%s1591_s4 + $0x28] sm:$0xff]  ;;  %vm512_vm12 = vcmask 1046528   ;;  %s1608_s12 = sld [smem:[#allocation13_spill]] }
  0x30   : > { %v1190_v5 = vld [vmem:[%s1591_s4 + $0x78] sm:$0xff]  ;;  %713 = vmatpush.bf16.msra.mxu0 %v1182_v4  ;;  %v1189_v10 = vld [vmem:[%s1591_s4 + $0x70] sm:$0xff]  ;;  %v464_v14 = vstv %s1039_s18  ;;  %v1188_v16 = vld [vmem:[%s1591_s4 + $0x68] sm:$0xff]  ;;  %vm498_vm13 = vsmask.f32 7424  ;;  %s1168_s17 = sshll.u32 %s1283_s30, 3 }
  0x31   : > { %v1198_v6 = vld [vmem:[%s1591_s4 + $0xb8] sm:$0xff]  ;;  %727 = vmatpush.bf16.msra.mxu1 %v1190_v5  ;;  %v1453_v11 = vshrl.u32 %v460_v7, 7  ;;  %v1197_v12 = vld [vmem:[%s1591_s4 + $0xb0] sm:$0xff]  ;;  %v1196_v18 = vld [vmem:[%s1591_s4 + $0xa8] sm:$0xff]  ;;  %v850_v44 = vstv %s1168_s17 }
  0x32   : > { %v1206_v8 = vld [vmem:[%s1593_s6 + $0x38] sm:$0xff]  ;;  %741 = vmatpush.bf16.msra.mxu2 %v1198_v6  ;;  %v1205_v13 = vld [vmem:[%s1593_s6 + $0x30] sm:$0xff]  ;;  %v1204_v19 = vld [vmem:[%s1593_s6 + $0x28] sm:$0xff] }
  0x33   : > { %826 = vmatpush.bf16.msra.mxu3 %v1206_v8  ;;  %v462_v17 = vadd.s32 8, %v1453_v11  ;;  %v465_v20 = vadd.s32 %v464_v14, %v1453_v11  ;;  %v463_v21 = vadd.s32 16, %v1453_v11  ;;  %v1179_v22 = vld [vmem:[%s1591_s4 + $0x20] sm:$0xff]  ;;  %v432_v32 = vld [vmem:[%s1407_s7 + $0x8] sm:$0x1]  ;;  %v1178_v37 = vld [vmem:[%s1591_s4 + $0x18] sm:$0xff] }
  0x34   : > { %714 = vmatpush.bf16.msra.mxu0 %v1181_v9  ;;  %v1187_v23 = vld [vmem:[%s1591_s4 + $0x60] sm:$0xff]  ;;  %v435_v36 = vunpack.c.l.bf16 %v432_v32  ;;  %v1186_v38 = vld [vmem:[%s1591_s4 + $0x58] sm:$0xff]  ;;  %v1177_v47 = vld [vmem:[%s1591_s4 + $0x10] sm:$0xff] }
  0x35   : > { %728 = vmatpush.bf16.msra.mxu1 %v1189_v10  ;;  %v1195_v24 = vld [vmem:[%s1591_s4 + $0xa0] sm:$0xff]  ;;  %v466_v27 = vadd.s32 %v464_v14, %v462_v17  ;;  %vm468_vm0 = vcmp.ge.s32.totalorder %v465_v20, 0  ;;  %v467_v33 = vadd.s32 %v464_v14, %v463_v21  ;;  %vm471_vm1 = vcmp.lt.s32.totalorder %v465_v20, 64  ;;  %v1194_v39 = vld [vmem:[%s1591_s4 + $0x98] sm:$0xff]  ;;  %v1185_v48 = vld [vmem:[%s1591_s4 + $0x50] sm:$0xff] }
  0x36   : > { %742 = vmatpush.bf16.msra.mxu2 %v1197_v12  ;;  %v1203_v25 = vld [vmem:[%s1593_s6 + $0x20] sm:$0xff]  ;;  %v1202_v40 = vld [vmem:[%s1593_s6 + $0x18] sm:$0xff]  ;;  %vm1510_vm4 = vmand %vm468_vm0, %vm471_vm1 }
  0x37   : > { %827 = vmatpush.bf16.msra.mxu3 %v1205_v13  ;;  %v1208_v26 = vld [vmem:[%s1407_s7] sm:$0xff]   ;;  %vm469_vm2 = vcmp.ge.s32.totalorder %v466_v27, 0  ;;  %vm472_vm3 = vcmp.lt.s32.totalorder %v466_v27, 64  ;;  %vm470_vm5 = vcmp.ge.s32.totalorder %v467_v33, 0  ;;  %vm473_vm6 = vcmp.lt.s32.totalorder %v467_v33, 64  ;;  %v1193_v50 = vld [vmem:[%s1591_s4 + $0x90] sm:$0xff] }
  0x38   : > { %715 = vmatpush.bf16.msra.mxu0 %v1180_v15  ;;  %v1209_v28 = vunpack.c.l.bf16 %v1208_v26  ;;  %v1210_v29 = vunpack.c.h.bf16 %v1208_v26  ;;  %v1255_v30 = vld [vmem:[%s1589_s2] ss:$0 sm:$0xff]  ;;  %vm475_vm9 = vmand %vm469_vm2, %vm472_vm3  ;;  %v1201_v51 = vld [vmem:[%s1593_s6 + $0x10] sm:$0xff] }
  0x39   : > { %729 = vmatpush.bf16.msra.mxu1 %v1188_v16  ;;  %v1256_v31 = vld [vmem:[%s1590_s3] ss:$0 sm:$0xff]  ;;  %v442_v43 = vmul.f32 %v1255_v30, %v435_v36  ;;  %vm476_vm11 = vmand %vm470_vm5, %vm473_vm6  ;;  %v1176_v59 = vld [vmem:[%s1591_s4 + $0x8] sm:$0xff] }
  0x3a   : > { %743 = vmatpush.bf16.msra.mxu2 %v1196_v18  ;;  %v440_v34 = vmul.f32 %v1255_v30, %v1209_v28  ;;  %v441_v35 = vmul.f32 %v1255_v30, %v1210_v29  ;;  %v1184_v60 = vld [vmem:[%s1591_s4 + $0x48] sm:$0xff]  ;;  %v1175_v5 = vld [vmem:[%s1591_s4] sm:$0xff] }
  0x3b   : > { %828 = vmatpush.bf16.msra.mxu3 %v1204_v19  ;;  %v449_v49 = vadd.f32 %v1256_v31, %v442_v43  ;;  %v1192_v62 = vld [vmem:[%s1591_s4 + $0x88] sm:$0xff]  ;;  %v1183_v6 = vld [vmem:[%s1591_s4 + $0x40] sm:$0xff] }
  0x3c   : > { %716 = vmatpush.bf16.msra.mxu0 %v1179_v22  ;;  %v447_v41 = vadd.f32 %v1256_v31, %v440_v34  ;;  %v448_v42 = vadd.f32 %v1256_v31, %v441_v35  ;;  %v1200_v63 = vld [vmem:[%s1593_s6 + $0x8] sm:$0xff]  ;;  %v1191_v7 = vld [vmem:[%s1591_s4 + $0x80] sm:$0xff] }
  0x3d   : > { %730 = vmatpush.bf16.msra.mxu1 %v1187_v23  ;;  %vm452_vm10 = vcmp.gt.f32.partialorder %v449_v49, 0.0  ;;  %v455_v56 = vmul.f32 0.3, %v449_v49  ;;  %v1199_v9 = vld [vmem:[%s1593_s6] sm:$0xff]  ;;  %v756_v14 = vld [vmem:[%s1422_s14 + $0x8] sm:$0xff] }
  0x3e   : > { %744 = vmatpush.bf16.msra.mxu2 %v1195_v24  ;;  %vm450_vm7 = vcmp.gt.f32.partialorder %v447_v41, 0.0  ;;  %vm451_vm8 = vcmp.gt.f32.partialorder %v448_v42, 0.0  ;;  %v453_v45 = vmul.f32 0.3, %v447_v41  ;;  %v454_v46 = vmul.f32 0.3, %v448_v42 }
  0x3f   : > { %829 = vmatpush.bf16.msra.mxu3 %v1203_v25  ;;  %v458_v61 = vsel %vm452_vm10, %v449_v49, %v455_v56  ;;  %v755_v13 = vld [vmem:[%s1422_s14] sm:$0xff] }
  0x40   : > { %717 = vmatpush.bf16.msra.mxu0 %v1178_v37  ;;  %v456_v52 = vsel %vm450_vm7, %v447_v41, %v453_v45  ;;  %v457_v53 = vsel %vm451_vm8, %v448_v42, %v454_v46  ;;  %v485_v2 = vsel %vm476_vm11, %v458_v61, 0.0  ;;  %v757_v20 = vpack.c.bf16 %v756_v14, %v755_v13  ;;  %v1257_v25 = vld [vmem:[%s1592_s5] ss:$0 sm:$0xff] }
  0x41   : > { %731 = vmatpush.bf16.msra.mxu1 %v1186_v38  ;;  %v483_v54 = vsel %vm1510_vm4, %v456_v52, 0.0  ;;  %v484_v55 = vsel %vm475_vm9, %v457_v53, 0.0  ;;  %v488_v3 = vpack.c.bf16 %v485_v2, %v485_v2  ;;  %v1258_v30 = vld [vmem:[%s1608_s12] ss:$0 sm:$0xff]  ;;  %v851_v46 = vadd.s32 %v850_v44, %v1453_v11 }
  0x42   : > { %745 = vmatpush.bf16.msra.mxu2 %v1194_v39  ;;  %v486_v57 = vpack.c.bf16 %v483_v54, %v483_v54  ;;  %v487_v58 = vpack.c.bf16 %v484_v55, %v484_v55 }
  0x43   : > { %830 = vmatpush.bf16.msra.mxu3 %v1202_v40  ;;  %v496_v8 = vunpack.c.l.b16 %v488_v3  ;;  %vm852_vm14 = vcmp.lt.s32.totalorder %v851_v46, 32 }
  0x44   : > { %718 = vmatpush.bf16.msra.mxu0 %v1177_v47  ;;  %v491_v0 = vunpack.c.l.b16 %v486_v57  ;;  %v492_v1 = vunpack.c.l.b16 %v487_v58  ;;  %v1301_v47 = vmov 0.0  }
  0x45   : > { %732 = vmatpush.bf16.msra.mxu1 %v1185_v48  ;;  %v497_v15 = vpack.c.b16 %v496_v8, %v496_v8  ;;  %v1169_v48 = vsel %vm852_vm14, 1.0, %v1301_v47 }
  0x46   : > { %746 = vmatpush.bf16.msra.mxu2 %v1193_v50  ;;  %v493_v4 = vpack.c.b16 %v492_v1, %v491_v0 }
  0x47   : > { %831 = vmatpush.bf16.msra.mxu3 %v1201_v51  ;;  %v507_v18 = vshll.u32 %v497_v15, 16  ;;  %v514_v19 = vrot.slane %v497_v15, 1 }
  0x48   : > { %719 = vmatpush.bf16.msra.mxu0 %v1176_v59  ;;  %v500_v10 = vshrl.u32 %v493_v4, 16  ;;  %v502_v12 = vshll.u32 %v493_v4, 16  ;;  %v513_v16 = vrot.slane %v493_v4, 1 }
  0x49   : > { %733 = vmatpush.bf16.msra.mxu1 %v1184_v60  ;;  %v509_v22 = vrot.slane %v507_v18, 1 }
  0x4a   : > { %747 = vmatpush.bf16.msra.mxu2 %v1192_v62  ;;  %v504_v17 = vrot.slane %v502_v12, 1  ;;  %v515_v23 = vsel %vm512_vm12, %v513_v16, %v514_v19 }
  0x4b   : > { %832 = vmatpush.bf16.msra.mxu3 %v1200_v63 }
  0x4c   : > { %720 = vmatpush.bf16.msra.mxu0 %v1175_v5  ;;  %v505_v21 = vor.u32 %v504_v17, %v500_v10 }
  0x4d   : > { %734 = vmatpush.bf16.msra.mxu1 %v1183_v6 }
  0x4e   : > { %748 = vmatpush.bf16.msra.mxu2 %v1191_v7  ;;  %v510_v24 = vsel %vm498_vm13, %v505_v21, %v509_v22 }
  0x4f   : > { %833 = vmatpush.bf16.msra.mxu3 %v1199_v9  ;;  %721 = vmatmul.bf16.vlgmr.msra.gmra.mxu0 %v493_v4 }
  0x50   : > { %735 = vmatmul.bf16.vlgmr.msra.gmra.mxu1 %v510_v24 }
  0x51   : > { %749 = vmatmul.bf16.vlgmr.msra.gmra.mxu2 %v515_v23 }
  0x52   : > { %834 = vmatmul.bf16.vlgmr.msra.gmra.mxu3 %v757_v20 }
  0xcc   : > { %v722_v26 = vpop.f32.mrf.mxu0 }
  0xcd   : > { %v723_v27 = vadd.f32 %v1257_v25, %v722_v26  ;;  %v736_v28 = vpop.f32.mrf.mxu1 }
  0xcf   : > { %v737_v29 = vadd.f32 %v736_v28, %v723_v27 }
  0xd4   : > { %v750_v31 = vpop.f32.mrf.mxu2  ;;  %v724_v35 = vpop.f32.mrf.mxu0 }
  0xd5   : > { %v835_v32 = vpop.f32.mrf.mxu3  ;;  %v751_v33 = vadd.f32 %v750_v31, %v737_v29  ;;  %v725_v37 = vadd.f32 %v1257_v25, %v724_v35  ;;  %v738_v38 = vpop.f32.mrf.mxu1 }
  0xd6   : > { %v836_v34 = vadd.f32 %v1258_v30, %v835_v32 }
  0xd7   : > { %v739_v39 = vadd.f32 %v738_v38, %v725_v37 }
  0xd8   : > { %v840_v36 = vadd.f32 %v836_v34, %v751_v33 }
  0xda   : > { %842 = vst [vmem:[#allocation4] sm:$0xff] %v840_v36 }
  0xdc   : > { %v752_v40 = vpop.f32.mrf.mxu2 }
  0xdd   : > { %v837_v41 = vpop.f32.mrf.mxu3  ;;  %v753_v42 = vadd.f32 %v752_v40, %v739_v39 }
  0xde   : > { %v838_v43 = vadd.f32 %v1258_v30, %v837_v41 }
  0xe0   : > { %v841_v45 = vadd.f32 %v838_v43, %v753_v42 }
  0xe2   : > { %843 = vst [vmem:[#allocation4 + $0x8] sm:$0xff] %v841_v45 }
  0xe9   : > { %v844_v49 = vld [vmem:[#allocation4] ss:$2 sm:$0xff]  ;;  %v846_v50 = vld [vmem:[#allocation4 + $0x1] ss:$2 sm:$0xff] }
  0xea   : > { %v847_v51 = vmax.f32 %v844_v49, %v846_v50 }
  0xec   : > { %848 = vst [vmem:[%s1401_s15] sm:$0xff] %v847_v51  ;;  %v855_v52 = vmul.f32 %v1169_v48, %v847_v51 }
  0xee   : > { %v856_v53 = vrot.slane %v855_v52, 4 }
  0xf0   : > { %v857_v54 = vadd.f32 %v856_v53, %v855_v52 }
  0xf2   : > { %v858_v55 = vrot.slane %v857_v54, 2 }
  0xf4   : > { %v859_v56 = vadd.f32 %v858_v55, %v857_v54  ;;  %864 = sbr.rel (%p1029_p9) target bundleno = 251 (0xfb), region = 98 }
  0xf6   : > { %v860_v57 = vrot.slane %v859_v56, 1 }
  0xf8   : > { %v861_v58 = vadd.f32 %v860_v57, %v859_v56 }
  0xf9   : > { %v1302_v59 = vmov 0.0  }
  0xfa   : > { %865 = vst [vmem:[%s1396_s26] sm:$0x1] %v1302_v59 }
  0xfb PF:  {}
 0x101   : > { %v866_v11 = vld [vmem:[%s1396_s26] sm:$0x1] }
 0x102   : > { %v867_v60 = vadd.f32 %v866_v11, %v861_v58 }
 0x104   : > { %868 = vst [vmem:[%s1396_s26] sm:$0x1] %v867_v60 }
 0x105 PF: > { %s1609_s15 = sld [smem:[#allocation10_spill]] }
 0x106   : > { %s1610_s30 = sld [smem:[#allocation8_spill]] }
 0x107   : > { %s1611_s10 = sld [smem:[#allocation9_spill]] }
 0x108   : > { %s1612_s11 = sld [smem:[#allocation11_spill]] }
 0x109   : > { %s1613_s12 = sld [smem:[#allocation12_spill]] }
 0x10b   : > { %s20_s13 = sadd.s32 1, %s1609_s15  }
 0x10c   : > { %p17_p11 = scmp.ge.s32.totalorder %s20_s13, 10  }
 0x10e   :  { %19 = sbr.rel (!%p17_p11) target bundleno = 3 (0x3), region = 156 }
 0x113   :  { %908 = vsyncmov [#allocation3] }
 0x116   :  { %s909_s26 = vpop.sfrf %908 }
 0x117   :  { %p1173_p12 = scmp.ne.s32.totalorder %s909_s26, 0 }
 0x119   :  { %913 = shalt.err (%p1173_p12)  }
 0x11a   :  { %915 = vsyncmov [#allocation3 + $0x1] }
 0x11d   :  { %s916_s22 = vpop.sfrf %915 }
 0x11e   :  { %p1174_p13 = scmp.ne.s32.totalorder %s916_s22, 0 }
 0x120   :  { %920 = shalt.err (%p1174_p13)  }

// kernel: resblock_forward.2
= control target key start
LH: loop header
LB: loop body
LE: loop exit
PB: predicated region body
PF: predicated region fallthrough
CT: control target
= control target key end

     0   :  { %s1182_s21 = smov 0   ;;  %s1184_s22 = smov 0   ;;  %s1391_s0 = inlined_call_operand.vmem [shape: f32[2,68,128], index: 0, kind: input, shape index: {}]   ;;  %s1392_s1 = inlined_call_operand.vmem [shape: f32[1,128], index: 1, kind: input, shape index: {}]   ;;  %s1393_s2 = inlined_call_operand.vmem [shape: f32[1,128], index: 2, kind: input, shape index: {}]   ;;  %s1394_s3 = inlined_call_operand.vmem [shape: bf16[384,128], index: 3, kind: input, shape index: {}]   ;;  %s1395_s4 = inlined_call_operand.vmem [shape: f32[1,128], index: 4, kind: input, shape index: {}]   ;;  %s1396_s5 = inlined_call_operand.vmem [shape: bf16[2,4,18,128], index: 5, kind: output, shape index: {0}]   ;;  %s1397_s6 = inlined_call_operand.vmem [shape: f32[2,2,128], index: 6, kind: output, shape index: {1}]  }
   0x1   :  { %s1186_s23 = smov 0   ;;  %s1188_s24 = smov 0  }
   0x2   :  { %s1190_s25 = smov 0  }
   0x3 LB: > { %s26_s26 = sadd.s32 1, %s1135_s23  ;;  %s29_s27 = sadd.s32 1, %s1139_s24  ;;  %s1143_s25 = sphi %s1190_s25, %s17_s25   ;;  %s1139_s24 = sphi %s1188_s24, %s1403_s24   ;;  %s1135_s23 = sphi %s1186_s23, %s1402_s23   ;;  %s1131_s22 = sphi %s1184_s22, %s1401_s22   ;;  %s1127_s21 = sphi %s1182_s21, %s1400_s21  }
   0x4   : > { %p27_p0 = scmp.ge.s32.totalorder %s26_s26, 4  ;;  %p898_p1 = scmp.ge.s32.totalorder %s1143_s25, 1 }
   0x5   : > { %p195_p2 = scmp.lt.s32.totalorder %s1143_s25, 9 }
   0x6   : > { %s1405_s26 = smov (%p27_p0, %s26_s26), 0  ;;  %s1407_s27 = smov (!%p27_p0, %s29_s27), %s1139_s24 }
   0x7   : > { %p196_p3 = pnand %p898_p1, %p195_p2  ;;  %p31_p4 = scmp.ge.s32.totalorder %s1407_s27, 2 }
   0x8   : > { %p226_p5 = scmp.lt.s32.totalorder (!%p196_p3), %s1131_s22, 1  ;;  %p228_p6 = scmp.lt.s32.totalorder (!%p196_p3), %s1127_s21, 3 }
   0x9   : > { %s1409_s27 = smov (%p31_p4, %s1407_s27), 0  ;;  %199 = sbr.rel (%p196_p3) target bundleno = 261 (0x105), region = 36 }
   0xa   : > { %s240_s28 = ssub.s32 (!%p196_p3), 0, %s1127_s21  ;;  %p239_p7 = scmp.lt.s32.totalorder (!%p196_p3), %s1127_s21, 0 }
   0xb   : > { %s901_s13 = smin.u32 (!%p196_p3), %s1127_s21, %s240_s28  ;;  %p904_p9 = scmp.ne.s32.totalorder (!%p196_p3), %s1127_s21, 0 }
   0xc   : > { %s242_s15 = sand.u32 (!%p196_p3), 1, %s901_s13  }
   0xd   : > { %s243_s17 = ssub.s32 (!%p196_p3), 0, %s242_s15 }
   0xe   : > { %s227_s29 = scalar_select %p226_p5, %s1131_s22, 1 }
   0xf   : > { %s229_s30 = scalar_select %p228_p6, %s1127_s21, 3 }
  0x10   : > { %s1057_s7 = smul.u32 12, %s227_s29  ;;  %s900_s8 = sshll.u32 %s227_s29, 1 }
  0x11   : > { %s1056_s9 = smul.u32 3, %s229_s30  ;;  %s1224_s12 = scalar_lea.vmem %s1397_s6, %s900_s8 }
  0x12   : > { %s1411_s17 = smov (!%p239_p7, %s243_s17), %s242_s15  ;;  %254 = sbr.rel (%p904_p9) target bundleno = 30 (0x1e), region = 40 }
  0x13   : > { %s232_s14 = sadd.s32 %s1057_s7, %s1056_s9  ;;  %p903_p8 = scmp.lt.s32.totalorder %s1411_s17, 0 }
  0x14   : > { %s899_s16 = sshll.u32 %s232_s14, 2  ;;  %s249_s29 = sadd.s32 2, %s1411_s17 }
  0x15   : > { %s1231_s20 = scalar_lea.vmem %s1396_s5, %s899_s16  ;;  %s1413_s29 = smov (!%p903_p8, %s249_s29), %s1411_s17 }
  0x16   : > { %s255_s28 = smul.u32 (!%p904_p9), 72, %s1131_s22 }
  0x18   : > { %s256_s8 = scalar_lea.vmem %s1391_s0, %s255_s28 }
  0x19   : > { %v269_v0 = vld [vmem:[%s256_s8] sm:$0xff]  ;;  %v271_v1 = vld [vmem:[%s256_s8 + $0x8] sm:$0xff]  ;;  %v905_v2 = vld [vmem:[%s256_s8 + $0x10] sm:$0xf] }
  0x1a   : > { %270 = vst [vmem:[#allocation2] sm:$0xff] %v269_v0 }
  0x1b   : > { %272 = vst [vmem:[#allocation2 + $0x8] sm:$0xff] %v271_v1 }
  0x1c   : > { %284 = vst [vmem:[#allocation2 + $0x10] sm:$0xf] %v905_v2 }
  0x1d   : > { %288 = vsyncadd [#allocation3], 320 }
  0x1e PF: > { %s1243_s9 = sshll.u32 %s1127_s21, 4  ;;  %s290_s10 = smul.u32 24, %s1413_s29 }
  0x1f   : > { %s292_s13 = scalar_lea.sflag [#allocation3], %s1413_s29 }
  0x20   : > { %s1246_s11 = scalar_lea.vmem [#allocation2], %s290_s10 }
  0x21   : > { %1123 = dma.done.wait %s292_s13, 320 }
  0x22   : > { %1124 = vsyncadd %s292_s13, 4294966976  ;;  %s296_s14 = sadd.s32 1, %s1127_s21 }
  0x23   : > { %p907_p10 = scmp.ge.s32.totalorder %s296_s14, 4 }
  0x24   : > { %s301_s15 = ssub.s32 (!%p907_p10), 1, %s1413_s29  ;;  %s823_s16 = smul.u32 (!%p907_p10), 72, %s1131_s22 }
  0x25   : > { %300 = sbr.rel (%p907_p10) target bundleno = 47 (0x2f), region = 66  ;;  %s308_s8 = scalar_lea.sflag (!%p907_p10), [#allocation3], %s301_s15 }
  0x26   : > { %s306_s17 = smul.u32 (!%p907_p10), 24, %s301_s15  ;;  %s824_s18 = sadd.s32 (!%p907_p10), %s1243_s9, %s823_s16 }
  0x27   : > { %s825_s30 = scalar_lea.vmem (!%p907_p10), %s1391_s0, %s824_s18 }
  0x28   : > { %s307_s7 = scalar_lea.vmem (!%p907_p10), [#allocation2], %s306_s17 }
  0x2a   : > { %v909_v3 = vld [vmem:[%s825_s30 + $0x10] sm:$0xff]  ;;  %v910_v4 = vld [vmem:[%s825_s30 + $0x18] sm:$0xff]  ;;  %v911_v5 = vld [vmem:[%s825_s30 + $0x20] sm:$0xf] }
  0x2b   : > { %322 = vst [vmem:[%s307_s7] sm:$0xff] %v909_v3 }
  0x2c   : > { %324 = vst [vmem:[%s307_s7 + $0x8] sm:$0xff] %v910_v4 }
  0x2d   : > { %912 = vst [vmem:[%s307_s7 + $0x10] sm:$0xf] %v911_v5 }
  0x2e   : > { %340 = vsyncadd %s308_s8, 320 }
  0x2f PF: > { %v1026_v6 = vld [vmem:[%s1394_s3 + $0x38] sm:$0xff]  ;;  %s913_s17 = sadd.s32 4294967294, %s1243_s9  ;;  %v368_v9 = vlaneseq  ;;  %v1025_v10 = vld [vmem:[%s1394_s3 + $0x30] sm:$0xff]  ;;  %v1024_v17 = vld [vmem:[%s1394_s3 + $0x28] sm:$0xff]  ;;  %vm407_vm12 = vsmask.f32 7424 }
  0x30   : > { %v1034_v7 = vld [vmem:[%s1394_s3 + $0x78] sm:$0xff]  ;;  %627 = vmatpush.bf16.msra.mxu0 %v1026_v6  ;;  %v1033_v11 = vld [vmem:[%s1394_s3 + $0x70] sm:$0xff]  ;;  %1048 = vmatpush.bf16.msra.mxu3 %v1026_v6  ;;  %v372_v14 = vstv %s913_s17  ;;  %v1032_v18 = vld [vmem:[%s1394_s3 + $0x68] sm:$0xff]  ;;  %vm425_vm13 = vcmask 1046528   ;;  %s1010_s30 = sadd.s32 4294967295, %s1243_s9 }
  0x31   : > { %v1042_v8 = vld [vmem:[%s1394_s3 + $0xb8] sm:$0xff]  ;;  %645 = vmatpush.bf16.msra.mxu1 %v1034_v7  ;;  %v1272_v12 = vshrl.u32 %v368_v9, 7  ;;  %v1041_v13 = vld [vmem:[%s1394_s3 + $0xb0] sm:$0xff]  ;;  %v1040_v20 = vld [vmem:[%s1394_s3 + $0xa8] sm:$0xff] }
  0x32   : > { %663 = vmatpush.bf16.msra.mxu2 %v1042_v8  ;;  %v1023_v21 = vld [vmem:[%s1394_s3 + $0x20] sm:$0xff]  ;;  %v1022_v34 = vld [vmem:[%s1394_s3 + $0x18] sm:$0xff]  ;;  %v1021_v46 = vld [vmem:[%s1394_s3 + $0x10] sm:$0xff] }
  0x33   : > { %v1278_v15 = vadd.s32 8, %v1272_v12  ;;  %v1281_v16 = vadd.s32 16, %v1272_v12  ;;  %v373_v19 = vadd.s32 %v372_v14, %v1272_v12  ;;  %v1100_v26 = vld [vmem:[%s1392_s1] ss:$0 sm:$0xff]  ;;  %v1030_v38 = vld [vmem:[%s1394_s3 + $0x58] sm:$0xff]  ;;  %v1029_v47 = vld [vmem:[%s1394_s3 + $0x50] sm:$0xff] }
  0x34   : > { %628 = vmatpush.bf16.msra.mxu0 %v1025_v10  ;;  %1049 = vmatpush.bf16.msra.mxu3 %v1025_v10  ;;  %v341_v22 = vld [vmem:[%s1246_s11] sm:$0xff]  ;;  %v342_v23 = vld [vmem:[%s1246_s11 + $0x8] sm:$0xff]  ;;  %v343_v29 = vld [vmem:[%s1246_s11 + $0x10] sm:$0xf]  ;;  %vm687_vm14 = vcmp.ge.s32.totalorder %v1272_v12, 1 }
  0x35   : > { %646 = vmatpush.bf16.msra.mxu1 %v1033_v11  ;;  %v374_v24 = vadd.s32 %v372_v14, %v1278_v15  ;;  %v375_v25 = vadd.s32 %v372_v14, %v1281_v16  ;;  %v1101_v27 = vld [vmem:[%s1393_s2] ss:$0 sm:$0xff]  ;;  %vm376_vm0 = vcmp.ge.s32.totalorder %v373_v19, 0  ;;  %v348_v31 = vmul.f32 %v1100_v26, %v341_v22  ;;  %v1038_v39 = vld [vmem:[%s1394_s3 + $0x98] sm:$0xff]  ;;  %v1037_v51 = vld [vmem:[%s1394_s3 + $0x90] sm:$0xff] }
  0x36   : > { %664 = vmatpush.bf16.msra.mxu2 %v1041_v13  ;;  %v1031_v28 = vld [vmem:[%s1394_s3 + $0x60] sm:$0xff]  ;;  %v349_v32 = vmul.f32 %v1100_v26, %v342_v23  ;;  %vm379_vm1 = vcmp.lt.s32.totalorder %v373_v19, 64  ;;  %v350_v33 = vmul.f32 %v1100_v26, %v343_v29  ;;  %v1020_v58 = vld [vmem:[%s1394_s3 + $0x8] sm:$0xff]  ;;  %v697_v22 = vstv %s1010_s30 }
  0x37   : > { %v1039_v30 = vld [vmem:[%s1394_s3 + $0xa0] sm:$0xff]  ;;  %vm377_vm2 = vcmp.ge.s32.totalorder %v374_v24, 0  ;;  %vm380_vm3 = vcmp.lt.s32.totalorder %v374_v24, 64  ;;  %vm378_vm4 = vcmp.ge.s32.totalorder %v375_v25, 0  ;;  %v355_v35 = vadd.f32 %v1101_v27, %v348_v31  ;;  %vm1323_vm6 = vmand %vm376_vm0, %vm379_vm1  ;;  %v1028_v59 = vld [vmem:[%s1394_s3 + $0x48] sm:$0xff] }
  0x38   : > { %629 = vmatpush.bf16.msra.mxu0 %v1024_v17  ;;  %1050 = vmatpush.bf16.msra.mxu3 %v1024_v17  ;;  %v356_v36 = vadd.f32 %v1101_v27, %v349_v32  ;;  %v357_v37 = vadd.f32 %v1101_v27, %v350_v33  ;;  %vm381_vm5 = vcmp.lt.s32.totalorder %v375_v25, 64  ;;  %vm383_vm9 = vmand %vm377_vm2, %vm380_vm3  ;;  %v1036_v61 = vld [vmem:[%s1394_s3 + $0x88] sm:$0xff]  ;;  %v1019_v2 = vld [vmem:[%s1394_s3] sm:$0xff]  ;;  %v698_v27 = vadd.s32 %v697_v22, %v1272_v12 }
  0x39   : > { %647 = vmatpush.bf16.msra.mxu1 %v1032_v18  ;;  %vm358_vm7 = vcmp.gt.f32.partialorder %v355_v35, 0.0  ;;  %v361_v41 = vmul.f32 0.3, %v355_v35  ;;  %vm384_vm11 = vmand %vm378_vm4, %vm381_vm5  ;;  %v1027_v3 = vld [vmem:[%s1394_s3 + $0x40] sm:$0xff]  ;;  %v699_v29 = vadd.s32 %v697_v22, %v1278_v15  ;;  %v700_v31 = vadd.s32 %v697_v22, %v1281_v16 }
  0x3a   : > { %665 = vmatpush.bf16.msra.mxu2 %v1040_v20  ;;  %vm359_vm8 = vcmp.gt.f32.partialorder %v356_v36, 0.0  ;;  %v362_v42 = vmul.f32 0.3, %v356_v36  ;;  %vm360_vm10 = vcmp.gt.f32.partialorder %v357_v37, 0.0  ;;  %v363_v43 = vmul.f32 0.3, %v357_v37 }
  0x3b   : > { %v364_v44 = vsel %vm358_vm7, %v355_v35, %v361_v41  ;;  %v1035_v5 = vld [vmem:[%s1394_s3 + $0x80] sm:$0xff]  ;;  %vm701_vm15 = vcmp.lt.s32.totalorder %v698_v27, 64  ;;  %vm702_vm0 = vcmp.lt.s32.totalorder %v699_v29, 64  ;;  %vm692_vm2 = vcmp.lt.s32.totalorder %v1281_v16, 17 }
  0x3c   : > { %630 = vmatpush.bf16.msra.mxu0 %v1023_v21  ;;  %1051 = vmatpush.bf16.msra.mxu3 %v1023_v21  ;;  %v365_v45 = vsel %vm359_vm8, %v356_v36, %v362_v42  ;;  %v391_v48 = vsel %vm1323_vm6, %v364_v44, 0.0  ;;  %v366_v50 = vsel %vm360_vm10, %v357_v37, %v363_v43  ;;  %v1102_v20 = vld [vmem:[%s1395_s4] ss:$0 sm:$0xff]  ;;  %vm704_vm1 = vmand %vm687_vm14, %vm701_vm15  ;;  %vm703_vm3 = vcmp.lt.s32.totalorder %v700_v31, 64 }
  0x3d   : > { %648 = vmatpush.bf16.msra.mxu1 %v1031_v28  ;;  %v392_v49 = vsel %vm383_vm9, %v365_v45, 0.0  ;;  %v394_v52 = vpack.c.bf16 %v391_v48, %v391_v48  ;;  %v393_v54 = vsel %vm384_vm11, %v366_v50, 0.0  ;;  %vm706_vm4 = vmand %vm692_vm2, %vm703_vm3  ;;  %vm717_vm5 = vcmask 1041408  }
  0x3e   : > { %666 = vmatpush.bf16.msra.mxu2 %v1039_v30  ;;  %v395_v53 = vpack.c.bf16 %v392_v49, %v392_v49  ;;  %v396_v55 = vpack.c.bf16 %v393_v54, %v393_v54 }
  0x3f   : > { %v400_v56 = vunpack.c.l.b16 %v394_v52 }
  0x40   : > { %631 = vmatpush.bf16.msra.mxu0 %v1022_v34  ;;  %1052 = vmatpush.bf16.msra.mxu3 %v1022_v34  ;;  %v401_v57 = vunpack.c.l.b16 %v395_v53  ;;  %v402_v60 = vunpack.c.l.b16 %v396_v55 }
  0x41   : > { %649 = vmatpush.bf16.msra.mxu1 %v1030_v38 }
  0x42   : > { %667 = vmatpush.bf16.msra.mxu2 %v1038_v39  ;;  %v403_v62 = vpack.c.b16 %v401_v57, %v400_v56  ;;  %v404_v63 = vpack.c.b16 %v402_v60, %v402_v60  ;;  %v1145_v39 = vmov 0.0  }
  0x43   : > { %v1012_v40 = vsel %vm702_vm0, 1.0, %v1145_v39  ;;  %v1011_v41 = vsel %vm704_vm1, 1.0, %v1145_v39  ;;  %v1013_v45 = vsel %vm706_vm4, 1.0, %v1145_v39 }
  0x44   : > { %632 = vmatpush.bf16.msra.mxu0 %v1021_v46  ;;  %1053 = vmatpush.bf16.msra.mxu3 %v1021_v46  ;;  %v409_v0 = vshrl.u32 %v403_v62, 16  ;;  %v411_v1 = vshll.u32 %v403_v62, 16  ;;  %v416_v4 = vshll.u32 %v404_v63, 16  ;;  %v426_v7 = vrot.slane %v403_v62, 1 }
  0x45   : > { %650 = vmatpush.bf16.msra.mxu1 %v1029_v47  ;;  %v427_v8 = vrot.slane %v404_v63, 1  ;;  %v420_v14 = vshrl.u32 %v404_v63, 16 }
  0x46   : > { %668 = vmatpush.bf16.msra.mxu2 %v1037_v51  ;;  %v413_v6 = vrot.slane %v411_v1, 1  ;;  %v418_v9 = vrot.slane %v416_v4, 1 }
  0x47   : > { %v428_v13 = vsel %vm425_vm13, %v426_v7, %v427_v8 }
  0x48   : > { %633 = vmatpush.bf16.msra.mxu0 %v1020_v58  ;;  %1054 = vmatpush.bf16.msra.mxu3 %v1020_v58  ;;  %v414_v10 = vor.u32 %v413_v6, %v409_v0  ;;  %v422_v17 = vor.u32 %v420_v14, %v418_v9 }
  0x49   : > { %651 = vmatpush.bf16.msra.mxu1 %v1028_v59 }
  0x4a   : > { %669 = vmatpush.bf16.msra.mxu2 %v1036_v61  ;;  %v419_v11 = vsel %vm407_vm12, %v414_v10, %v418_v9 }
  0x4c   : > { %634 = vmatpush.bf16.msra.mxu0 %v1019_v2  ;;  %1055 = vmatpush.bf16.msra.mxu3 %v1019_v2 }
  0x4d   : > { %652 = vmatpush.bf16.msra.mxu1 %v1027_v3 }
  0x4e   : > { %670 = vmatpush.bf16.msra.mxu2 %v1035_v5 }
  0x4f   : > { %635 = vmatmul.bf16.vlgmr.msra.gmra.mxu0 %v403_v62  ;;  %640 = vmatmul.bf16.vlgmr.msra.gmra.mxu3 %v404_v63 }
  0x50   : > { %653 = vmatmul.bf16.vlgmr.msra.gmra.mxu1 %v419_v11 }
  0x51   : > { %671 = vmatmul.bf16.vlgmr.msra.gmra.mxu2 %v428_v13 }
  0x60   : > { %658 = vmatmul.bf16.gmra.mxu1 %v422_v17 }
  0x61   : > { %676 = vmatmul.bf16.gmra.mxu2 %v427_v8 }
  0xcc   : > { %v636_v18 = vpop.f32.mrf.mxu0 }
  0xcd   : > { %v654_v19 = vpop.f32.mrf.mxu1  ;;  %v637_v24 = vadd.f32 %v1102_v20, %v636_v18 }
  0xcf   : > { %v655_v30 = vadd.f32 %v654_v19, %v637_v24 }
  0xd2   : > { %v641_v23 = vpop.f32.mrf.mxu3 }
  0xd3   : > { %v642_v36 = vadd.f32 %v1102_v20, %v641_v23 }
  0xd4   : > { %v672_v21 = vpop.f32.mrf.mxu2  ;;  %v638_v25 = vpop.f32.mrf.mxu0 }
  0xd5   : > { %v656_v26 = vpop.f32.mrf.mxu1  ;;  %v639_v28 = vadd.f32 %v1102_v20, %v638_v25  ;;  %v673_v35 = vadd.f32 %v672_v21, %v655_v30 }
  0xd7   : > { %v657_v32 = vadd.f32 %v656_v26, %v639_v28  ;;  %v713_v43 = vmul.f32 %v1011_v41, %v673_v35 }
  0xd9   : > { %v726_v16 = vmul.f32 %v713_v43, %v713_v43 }
  0xda   : > { %v643_v34 = vpop.f32.mrf.mxu3 }
  0xdc   : > { %v674_v33 = vpop.f32.mrf.mxu2 }
  0xdd   : > { %v675_v37 = vadd.f32 %v674_v33, %v657_v32  ;;  %v659_v38 = vpop.f32.mrf.mxu1 }
  0xde   : > { %v660_v12 = vadd.f32 %v659_v38, %v642_v36 }
  0xdf   : > { %v1046_v15 = vpack.c.bf16 %v675_v37, %v673_v35  ;;  %v714_v42 = vmul.f32 %v1012_v40, %v675_v37 }
  0xe1   : > { %1047 = vst [vmem:[%s1231_s20] sm:$0xff] %v1046_v15   ;;  %v727_v48 = vmul.f32 %v714_v42, %v714_v42  ;;  %v716_v51 = vadd.f32 %v714_v42, %v713_v43 }
  0xe3   : > { %v729_v54 = vadd.f32 %v727_v48, %v726_v16 }
  0xe4   : > { %v677_v44 = vpop.f32.mrf.mxu2 }
  0xe5   : > { %v678_v46 = vadd.f32 %v677_v44, %v660_v12  ;;  %v661_v47 = vpop.f32.mrf.mxu1 }
  0xe7   : > { %v683_v49 = vpack.c.bf16 %v678_v46, %v678_v46  ;;  %v715_v50 = vmul.f32 %v1013_v45, %v678_v46 }
  0xe9   : > { %686 = vst [vmem:[%s1231_s20 + $0x8] sm:$0x1] %v683_v49  ;;  %v718_v52 = vsel %vm717_vm5, %v715_v50, 0.0  ;;  %v728_v53 = vmul.f32 %v715_v50, %v715_v50 }
  0xea   : > { %v719_v55 = vadd.f32 %v718_v52, %v716_v51 }
  0xeb   : > { %v730_v56 = vsel %vm717_vm5, %v728_v53, 0.0 }
  0xec   : > { %v720_v57 = vrot.slane %v719_v55, 4  ;;  %v731_v58 = vadd.f32 %v730_v56, %v729_v54  ;;  %v679_v59 = vpop.f32.mrf.mxu2 }
  0xee   : > { %v721_v60 = vadd.f32 %v720_v57, %v719_v55  ;;  %v732_v61 = vrot.slane %v731_v58, 4 }
  0xf0   : > { %v722_v62 = vrot.slane %v721_v60, 2  ;;  %v733_v63 = vadd.f32 %v732_v61, %v731_v58 }
  0xf2   : > { %v723_v0 = vadd.f32 %v722_v62, %v721_v60  ;;  %v734_v1 = vrot.slane %v733_v63, 2 }
  0xf4   : > { %v724_v2 = vrot.slane %v723_v0, 1  ;;  %v735_v3 = vadd.f32 %v734_v1, %v733_v63  ;;  %740 = sbr.rel (%p904_p9) target bundleno = 251 (0xfb), region = 92 }
  0xf6   : > { %v725_v4 = vadd.f32 %v724_v2, %v723_v0  ;;  %v736_v5 = vrot.slane %v735_v3, 1 }
  0xf8   : > { %v737_v6 = vadd.f32 %v736_v5, %v735_v3 }
  0xf9   : > { %v1146_v7 = vmov 0.0  }
  0xfa   : > { %741 = vst [vmem:[%s1224_s12] sm:$0x3] %v1146_v7 }
  0xfb PF: > { %vm743_vm6 = vcmask 1040384  }
  0xfc   : > { %v744_v9 = vsel %vm743_vm6, %v725_v4, %v737_v6 }
 0x101   : > { %v742_v8 = vld [vmem:[%s1224_s12] sm:$0x3] }
 0x102   : > { %v745_v10 = vadd.f32 %v744_v9, %v742_v8 }
 0x104   : > { %746 = vst [vmem:[%s1224_s12] sm:$0x3] %v745_v10 }
 0x105 PF: > { %s17_s25 = sadd.s32 1, %s1143_s25   ;;  %s1400_s21 = smov %s1135_s23 }
 0x106   : > { %p14_p11 = scmp.ge.s32.totalorder %s17_s25, 10   ;;  %s1401_s22 = smov %s1139_s24 }
 0x107   : > { %s1402_s23 = smov %s1405_s26  ;;  %s1403_s24 = smov %s1409_s27 }
 0x108   :  { %16 = sbr.rel (!%p14_p11) target bundleno = 3 (0x3), region = 158 }
 0x10d   :  { %790 = vsyncmov [#allocation3] }
 0x110   :  { %s791_s12 = vpop.sfrf %790 }
 0x111   :  { %p1017_p12 = scmp.ne.s32.totalorder %s791_s12, 0 }
 0x113   :  { %795 = shalt.err (%p1017_p12)  }
 0x114   :  { %797 = vsyncmov [#allocation3 + $0x1] }
 0x117   :  { %s798_s20 = vpop.sfrf %797 }
 0x118   :  { %p1018_p13 = scmp.ne.s32.totalorder %s798_s20, 0 }
 0x11a   :  { %802 = shalt.err (%p1018_p13)  }

</bundles_post_ra>
